<compile_context>
chip_gen: v5e
topology: v5e:2x2
jax: 0.10.0
libtpu: 0.0.40
codegen_flags: <defaults>
</compile_context>

<pallas_src>
import jax
import jax.numpy as jnp
from jax.experimental import pallas as pl


SH = 18          # fixed spatial grid height (= layer-2 output H for a 16x16 input)
SW = 18          # fixed spatial grid width
P = SH * SW      # 324 flattened spatial positions per (channel, image) row


# ----------------------------------------------------------------------------
# Fused forward kernel (single invocation, no grid)
# ----------------------------------------------------------------------------
def _convnet_kernel(x_ref, rowi_ref, colj_ref, bd1_ref, b1_ref, bd2_ref, b2_ref,
                    w1_ref, fb1_ref, w2_ref, fb2_ref, o_ref):
    n = x_ref.shape[0]          # batch
    c2 = w1_ref.shape[0]        # layer-2 output channels (8)
    rowi = rowi_ref[...]        # (1, P) int32: lane k -> spatial row  k // SW
    colj = colj_ref[...]        # (1, P) int32: lane k -> spatial col  k %  SW

    def shift(r, s):
        # Static circular lane shift: out[:, k] = r[:, k - s]  (s in {1, SW, SW+1}).
        # Only positions whose source is inside the image are consumed (masked
        # below), so the wrapped first s lanes are don't-care.
        return jnp.concatenate([r[:, P - s:], r[:, :P - s]], axis=1)

    def pad_pool(r, rb, h_in, w_in):
        # r : (rows, P) ReLU'd conv output, valid spatial region (h_in, w_in).
        # rb: (rows, 1) border value = relu(folded bias), i.e. what
        #     Conv(k=1, pad=1) + BN + ReLU produces outside the image.
        # Returns MaxPool2d(k=2, stride=1) of the rb-padded plane; the valid
        # region grows to (h_in + 1, w_in + 1) on the same fixed grid.
        out = None
        for di in (0, 1):
            for dj in (0, 1):
                s = di * SW + dj
                src = shift(r, s) if s else r
                mask = ((rowi >= di) & (rowi < h_in + di)
                        & (colj >= dj) & (colj < w_in + dj))
                v = jnp.where(mask, src, rb)
                out = v if out is None else jnp.maximum(out, v)
        return out

    x0 = x_ref[...]                                              # (N, P), valid 16x16
    # layer1: Conv2d(1,4,k=1,pad=1) + BatchNorm (folded) + ReLU + MaxPool(2,1)
    z1 = jnp.dot(bd1_ref[...], x0, preferred_element_type=jnp.float32) + b1_ref[...]
    a1 = pad_pool(jnp.maximum(z1, 0.0), jnp.maximum(b1_ref[...], 0.0), SH - 2, SW - 2)
    # TODO(synk): nn.Dropout(0.3) is identity in eval/inference mode (no RNG here).
    # layer2: Conv2d(4,8,k=1,pad=1) + BatchNorm (folded) + ReLU + MaxPool(2,1)
    z2 = jnp.dot(bd2_ref[...], a1, preferred_element_type=jnp.float32) + b2_ref[...]
    a2 = pad_pool(jnp.maximum(z2, 0.0), jnp.maximum(b2_ref[...], 0.0), SH - 1, SW - 1)
    # a2 row (c*N + n) holds image n / channel c's 18x18 plane flattened exactly
    # in PyTorch reshape order, so fc1 is a sum of per-channel MXU dots.
    acc = None
    for c in range(c2):
        w1c = w1_ref[c].astype(jnp.float32)                       # (P, 32), bf16 -> f32
        part = jnp.dot(a2[c * n:(c + 1) * n, :], w1c,
                       preferred_element_type=jnp.float32)        # (N, 32)
        acc = part if acc is None else acc + part
    h = acc + fb1_ref[...]
    # fc2
    o_ref[...] = jnp.dot(h, w2_ref[...].astype(jnp.float32),
                         preferred_element_type=jnp.float32) + fb2_ref[...]


# ----------------------------------------------------------------------------
# Wrapper
# ----------------------------------------------------------------------------
def convnet_forward(x, kp):
    n, cin, h, w = x.shape
    assert cin == 1 and h == SH - 2 and w == SW - 2, (x.shape,)
    n_cls = kp["fb2"].shape[1]
    # Embed the (n,1,h,w) input into the fixed SHxSW flat grid (input layout
    # plumbing on a ~2 KB tensor; every activation pad happens inside the kernel).
    xg = jnp.pad(x[:, 0], ((0, 0), (0, SH - h), (0, SW - w))).reshape(n, P)

    def full(shape):
        return pl.BlockSpec(shape, lambda: (0,) * len(shape))

    return pl.pallas_call(
        _convnet_kernel,
        out_shape=jax.ShapeDtypeStruct((n, n_cls), jnp.float32),
        in_specs=[
            full((n, P)),                # embedded input
            full((1, P)),                # lane -> spatial row index
            full((1, P)),                # lane -> spatial col index
            full(kp["bd1"].shape),       # layer1 block-diag conv+BN weight (4n, 1n)
            full(kp["b1c"].shape),       # layer1 folded bias per row (4n, 1)
            full(kp["bd2"].shape),       # layer2 block-diag conv+BN weight (8n, 4n)
            full(kp["b2c"].shape),       # layer2 folded bias per row (8n, 1)
            full(kp["w1r"].shape),       # fc1 weight (8, 324, 32) bf16
            full(kp["fb1"].shape),       # fc1 bias (1, 32)
            full(kp["w2"].shape),        # fc2 weight (32, n_cls) bf16
            full(kp["fb2"].shape),       # fc2 bias (1, n_cls)
        ],
        out_specs=full((n, n_cls)),
    )(xg, kp["row_idx"], kp["col_idx"], kp["bd1"], kp["b1c"], kp["bd2"], kp["b2c"],
      kp["w1r"], kp["fb1"], kp["w2"], kp["fb2"])


# ----------------------------------------------------------------------------
# Parameter construction (deterministic, synthetic) + BN folding + kernel layout
# ----------------------------------------------------------------------------
def _fold_bn(conv_w, conv_b, gamma, beta, mean, var, eps=1e-5):
    scale = gamma / jnp.sqrt(var + eps)
    return conv_w * scale[:, None], (conv_b - mean) * scale + beta


def init_params(key, in_hw=(16, 16), num_classes=7):
    h, w = in_hw
    f_in = 8 * (h + 2) * (w + 2)  # flattened features after layer2
    ks = jax.random.split(key, 16)

    # layer1: Conv2d(1, 4, k=1) + BatchNorm2d(4)
    c1_w = 0.5 * jax.random.normal(ks[0], (4, 1), jnp.float32)
    c1_b = 0.1 * jax.random.normal(ks[1], (4,), jnp.float32)
    bn1 = (
        1.0 + 0.1 * jax.random.normal(ks[2], (4,), jnp.float32),
        0.1 * jax.random.normal(ks[3], (4,), jnp.float32),
        0.1 * jax.random.normal(ks[4], (4,), jnp.float32),
        jax.random.uniform(ks[5], (4,), jnp.float32, 0.5, 1.5),
    )
    l1_w, l1_b = _fold_bn(c1_w, c1_b, *bn1)

    # layer2: Conv2d(4, 8, k=1) + BatchNorm2d(8)
    c2_w = 0.5 * jax.random.normal(ks[6], (8, 4), jnp.float32)
    c2_b = 0.1 * jax.random.normal(ks[7], (8,), jnp.float32)
    bn2 = (
        1.0 + 0.1 * jax.random.normal(ks[8], (8,), jnp.float32),
        0.1 * jax.random.normal(ks[9], (8,), jnp.float32),
        0.1 * jax.random.normal(ks[10], (8,), jnp.float32),
        jax.random.uniform(ks[11], (8,), jnp.float32, 0.5, 1.5),
    )
    l2_w, l2_b = _fold_bn(c2_w, c2_b, *bn2)

    # fc1 / fc2 (weights stored already transposed for x @ W; bf16 storage
    # halves the dominant HBM transfer, math stays f32 in the kernel).
    fc1_w = (0.02 * jax.random.normal(ks[12], (f_in, 32), jnp.float32)).astype(jnp.bfloat16)
    fc1_b = 0.02 * jax.random.normal(ks[13], (1, 32), jnp.float32)
    fc2_w = (0.1 * jax.random.normal(ks[14], (32, num_classes), jnp.float32)).astype(jnp.bfloat16)
    fc2_b = 0.1 * jax.random.normal(ks[15], (1, num_classes), jnp.float32)

    return dict(
        l1_w=l1_w, l1_b=l1_b, l2_w=l2_w, l2_b=l2_b,
        fc1_w=fc1_w, fc1_b=fc1_b, fc2_w=fc2_w, fc2_b=fc2_b,
    )


def pack_params(p, batch):
    """One-time repack of the PyTorch-layout params into the fused kernel's layout."""
    eye = jnp.eye(batch, dtype=jnp.float32)
    lane = jnp.arange(P, dtype=jnp.int32)
    c2 = p["fc1_w"].shape[0] // P
    h1 = p["fc1_w"].shape[1]
    return dict(
        row_idx=(lane // SW).reshape(1, P).astype(jnp.int32),
        col_idx=(lane % SW).reshape(1, P).astype(jnp.int32),
        bd1=jnp.kron(p["l1_w"], eye),                 # (4*batch, 1*batch)
        b1c=jnp.repeat(p["l1_b"], batch)[:, None],    # (4*batch, 1)
        bd2=jnp.kron(p["l2_w"], eye),                 # (8*batch, 4*batch)
        b2c=jnp.repeat(p["l2_b"], batch)[:, None],    # (8*batch, 1)
        w1r=p["fc1_w"].reshape(c2, P, h1),            # (8, 324, 32), bf16
        fb1=p["fc1_b"],                               # (1, 32)
        w2=p["fc2_w"],                                # (32, num_classes), bf16
        fb2=p["fc2_b"],                               # (1, num_classes)
    )


# ----------------------------------------------------------------------------
# Pure-JAX reference (PyTorch semantics)
# ----------------------------------------------------------------------------
def reference_forward(x, p):
    def layer(xx, w, b):
        xp = jnp.pad(xx, ((0, 0), (0, 0), (1, 1), (1, 1)))
        y = jnp.einsum("oc,nchw->nohw", w, xp) + b[None, :, None, None]
        y = jnp.maximum(y, 0.0)
        return jnp.maximum(
            jnp.maximum(y[:, :, :-1, :-1], y[:, :, :-1, 1:]),
            jnp.maximum(y[:, :, 1:, :-1], y[:, :, 1:, 1:]),
        )

    o = layer(x, p["l1_w"], p["l1_b"])
    o = layer(o, p["l2_w"], p["l2_b"])
    o = o.reshape(o.shape[0], -1)
    o = o @ p["fc1_w"].astype(jnp.float32) + p["fc1_b"][0]
    return o @ p["fc2_w"].astype(jnp.float32) + p["fc2_b"][0]


if __name__ == "__main__":
    key = jax.random.PRNGKey(0)
    k_params, k_x = jax.random.split(key)

    params = init_params(k_params, in_hw=(16, 16), num_classes=7)
    x = jax.random.normal(k_x, (2, 1, 16, 16), jnp.float32)  # NCHW

    kparams = pack_params(params, batch=x.shape[0])
    out = jax.jit(convnet_forward)(x, kparams)
    out = jax.block_until_ready(out)

    ref = reference_forward(x, params)
    assert out.shape == (2, 7), out.shape
    assert jnp.allclose(out, ref, atol=1e-3, rtol=1e-3), (out, ref)
    print("KERNEL_OK")
</pallas_src>

<mosaic_0001>
module attributes {stable_mosaic.version = 11 : i64} {
  func.func @_convnet_kernel(%arg0: memref<2x324xf32, #tpu.memory_space<vmem>>, %arg1: memref<1x324xi32, #tpu.memory_space<vmem>>, %arg2: memref<1x324xi32, #tpu.memory_space<vmem>>, %arg3: memref<8x2xf32, #tpu.memory_space<vmem>>, %arg4: memref<8x1xf32, #tpu.memory_space<vmem>>, %arg5: memref<16x8xf32, #tpu.memory_space<vmem>>, %arg6: memref<16x1xf32, #tpu.memory_space<vmem>>, %arg7: memref<8x324x32xbf16, #tpu.memory_space<vmem>>, %arg8: memref<1x32xf32, #tpu.memory_space<vmem>>, %arg9: memref<32x7xbf16, #tpu.memory_space<vmem>>, %arg10: memref<1x7xf32, #tpu.memory_space<vmem>>, %arg11: memref<2x7xf32, #tpu.memory_space<vmem>>) attributes {dimension_semantics = [], scalar_prefetch = 0 : i64, scratch_operands = 0 : i64, tpu.core_type = #tpu.core_type<tc>} {
    %c0 = arith.constant 0 : index
    %c0_0 = arith.constant 0 : index
    %0 = vector.load %arg1[%c0, %c0_0] : memref<1x324xi32, #tpu.memory_space<vmem>>, vector<1x324xi32>
    %c0_1 = arith.constant 0 : index
    %c0_2 = arith.constant 0 : index
    %1 = vector.load %arg2[%c0_1, %c0_2] : memref<1x324xi32, #tpu.memory_space<vmem>>, vector<1x324xi32>
    %c0_3 = arith.constant 0 : index
    %c0_4 = arith.constant 0 : index
    %2 = vector.load %arg0[%c0_3, %c0_4] : memref<2x324xf32, #tpu.memory_space<vmem>>, vector<2x324xf32>
    %c0_5 = arith.constant 0 : index
    %c0_6 = arith.constant 0 : index
    %3 = vector.load %arg3[%c0_5, %c0_6] : memref<8x2xf32, #tpu.memory_space<vmem>>, vector<8x2xf32>
    %cst = arith.constant dense<0.000000e+00> : vector<8x324xf32>
    %4 = tpu.matmul %3, %2, %cst {dimension_numbers = #tpu.dot_dimension_numbers<[1], [0], [0], [1], [0, 0, 1, 1], [], []>} : vector<8x2xf32>, vector<2x324xf32>, vector<8x324xf32> -> vector<8x324xf32>
    %c0_7 = arith.constant 0 : index
    %c0_8 = arith.constant 0 : index
    %5 = vector.load %arg4[%c0_7, %c0_8] : memref<8x1xf32, #tpu.memory_space<vmem>>, vector<8x1xf32>
    %6 = vector.broadcast %5 : vector<8x1xf32> to vector<8x324xf32>
    %7 = arith.addf %4, %6 : vector<8x324xf32>
    %cst_9 = arith.constant 0.000000e+00 : f32
    %8 = vector.broadcast %cst_9 : f32 to vector<8x324xf32>
    %9 = arith.maximumf %7, %8 : vector<8x324xf32>
    %c0_10 = arith.constant 0 : index
    %c0_11 = arith.constant 0 : index
    %10 = vector.load %arg4[%c0_10, %c0_11] : memref<8x1xf32, #tpu.memory_space<vmem>>, vector<8x1xf32>
    %cst_12 = arith.constant 0.000000e+00 : f32
    %11 = vector.broadcast %cst_12 : f32 to vector<8x1xf32>
    %12 = arith.maximumf %10, %11 : vector<8x1xf32>
    %c0_i32 = arith.constant 0 : i32
    %13 = vector.broadcast %c0_i32 : i32 to vector<1x324xi32>
    %14 = arith.cmpi sge, %0, %13 : vector<1x324xi32>
    %c16_i32 = arith.constant 16 : i32
    %15 = vector.broadcast %c16_i32 : i32 to vector<1x324xi32>
    %16 = arith.cmpi slt, %0, %15 : vector<1x324xi32>
    %17 = arith.andi %14, %16 : vector<1x324xi1>
    %c0_i32_13 = arith.constant 0 : i32
    %18 = vector.broadcast %c0_i32_13 : i32 to vector<1x324xi32>
    %19 = arith.cmpi sge, %1, %18 : vector<1x324xi32>
    %20 = arith.andi %17, %19 : vector<1x324xi1>
    %c16_i32_14 = arith.constant 16 : i32
    %21 = vector.broadcast %c16_i32_14 : i32 to vector<1x324xi32>
    %22 = arith.cmpi slt, %1, %21 : vector<1x324xi32>
    %23 = arith.andi %20, %22 : vector<1x324xi1>
    %24 = vector.shape_cast %23 : vector<1x324xi1> to vector<1x324xi1>
    %25 = vector.broadcast %24 : vector<1x324xi1> to vector<8x324xi1>
    %26 = vector.shape_cast %12 : vector<8x1xf32> to vector<8x1xf32>
    %27 = vector.broadcast %26 : vector<8x1xf32> to vector<8x324xf32>
    %28 = arith.select %25, %9, %27 : vector<8x324xi1>, vector<8x324xf32>
    %29 = vector.extract_strided_slice %9 {offsets = [0, 323], sizes = [8, 1], strides = [1, 1]} : vector<8x324xf32> to vector<8x1xf32>
    %30 = vector.extract_strided_slice %9 {offsets = [0, 0], sizes = [8, 323], strides = [1, 1]} : vector<8x324xf32> to vector<8x323xf32>
    %31 = tpu.concatenate %29, %30 in 1 : vector<8x1xf32>, vector<8x323xf32> -> vector<8x324xf32>
    %c0_i32_15 = arith.constant 0 : i32
    %32 = vector.broadcast %c0_i32_15 : i32 to vector<1x324xi32>
    %33 = arith.cmpi sge, %0, %32 : vector<1x324xi32>
    %c16_i32_16 = arith.constant 16 : i32
    %34 = vector.broadcast %c16_i32_16 : i32 to vector<1x324xi32>
    %35 = arith.cmpi slt, %0, %34 : vector<1x324xi32>
    %36 = arith.andi %33, %35 : vector<1x324xi1>
    %c1_i32 = arith.constant 1 : i32
    %37 = vector.broadcast %c1_i32 : i32 to vector<1x324xi32>
    %38 = arith.cmpi sge, %1, %37 : vector<1x324xi32>
    %39 = arith.andi %36, %38 : vector<1x324xi1>
    %c17_i32 = arith.constant 17 : i32
    %40 = vector.broadcast %c17_i32 : i32 to vector<1x324xi32>
    %41 = arith.cmpi slt, %1, %40 : vector<1x324xi32>
    %42 = arith.andi %39, %41 : vector<1x324xi1>
    %43 = vector.shape_cast %42 : vector<1x324xi1> to vector<1x324xi1>
    %44 = vector.broadcast %43 : vector<1x324xi1> to vector<8x324xi1>
    %45 = vector.shape_cast %12 : vector<8x1xf32> to vector<8x1xf32>
    %46 = vector.broadcast %45 : vector<8x1xf32> to vector<8x324xf32>
    %47 = arith.select %44, %31, %46 : vector<8x324xi1>, vector<8x324xf32>
    %48 = arith.maximumf %28, %47 : vector<8x324xf32>
    %49 = vector.extract_strided_slice %9 {offsets = [0, 306], sizes = [8, 18], strides = [1, 1]} : vector<8x324xf32> to vector<8x18xf32>
    %50 = vector.extract_strided_slice %9 {offsets = [0, 0], sizes = [8, 306], strides = [1, 1]} : vector<8x324xf32> to vector<8x306xf32>
    %51 = tpu.concatenate %49, %50 in 1 : vector<8x18xf32>, vector<8x306xf32> -> vector<8x324xf32>
    %c1_i32_17 = arith.constant 1 : i32
    %52 = vector.broadcast %c1_i32_17 : i32 to vector<1x324xi32>
    %53 = arith.cmpi sge, %0, %52 : vector<1x324xi32>
    %c17_i32_18 = arith.constant 17 : i32
    %54 = vector.broadcast %c17_i32_18 : i32 to vector<1x324xi32>
    %55 = arith.cmpi slt, %0, %54 : vector<1x324xi32>
    %56 = arith.andi %53, %55 : vector<1x324xi1>
    %c0_i32_19 = arith.constant 0 : i32
    %57 = vector.broadcast %c0_i32_19 : i32 to vector<1x324xi32>
    %58 = arith.cmpi sge, %1, %57 : vector<1x324xi32>
    %59 = arith.andi %56, %58 : vector<1x324xi1>
    %c16_i32_20 = arith.constant 16 : i32
    %60 = vector.broadcast %c16_i32_20 : i32 to vector<1x324xi32>
    %61 = arith.cmpi slt, %1, %60 : vector<1x324xi32>
    %62 = arith.andi %59, %61 : vector<1x324xi1>
    %63 = vector.shape_cast %62 : vector<1x324xi1> to vector<1x324xi1>
    %64 = vector.broadcast %63 : vector<1x324xi1> to vector<8x324xi1>
    %65 = vector.shape_cast %12 : vector<8x1xf32> to vector<8x1xf32>
    %66 = vector.broadcast %65 : vector<8x1xf32> to vector<8x324xf32>
    %67 = arith.select %64, %51, %66 : vector<8x324xi1>, vector<8x324xf32>
    %68 = arith.maximumf %48, %67 : vector<8x324xf32>
    %69 = vector.extract_strided_slice %9 {offsets = [0, 305], sizes = [8, 19], strides = [1, 1]} : vector<8x324xf32> to vector<8x19xf32>
    %70 = vector.extract_strided_slice %9 {offsets = [0, 0], sizes = [8, 305], strides = [1, 1]} : vector<8x324xf32> to vector<8x305xf32>
    %71 = tpu.concatenate %69, %70 in 1 : vector<8x19xf32>, vector<8x305xf32> -> vector<8x324xf32>
    %c1_i32_21 = arith.constant 1 : i32
    %72 = vector.broadcast %c1_i32_21 : i32 to vector<1x324xi32>
    %73 = arith.cmpi sge, %0, %72 : vector<1x324xi32>
    %c17_i32_22 = arith.constant 17 : i32
    %74 = vector.broadcast %c17_i32_22 : i32 to vector<1x324xi32>
    %75 = arith.cmpi slt, %0, %74 : vector<1x324xi32>
    %76 = arith.andi %73, %75 : vector<1x324xi1>
    %c1_i32_23 = arith.constant 1 : i32
    %77 = vector.broadcast %c1_i32_23 : i32 to vector<1x324xi32>
    %78 = arith.cmpi sge, %1, %77 : vector<1x324xi32>
    %79 = arith.andi %76, %78 : vector<1x324xi1>
    %c17_i32_24 = arith.constant 17 : i32
    %80 = vector.broadcast %c17_i32_24 : i32 to vector<1x324xi32>
    %81 = arith.cmpi slt, %1, %80 : vector<1x324xi32>
    %82 = arith.andi %79, %81 : vector<1x324xi1>
    %83 = vector.shape_cast %82 : vector<1x324xi1> to vector<1x324xi1>
    %84 = vector.broadcast %83 : vector<1x324xi1> to vector<8x324xi1>
    %85 = vector.shape_cast %12 : vector<8x1xf32> to vector<8x1xf32>
    %86 = vector.broadcast %85 : vector<8x1xf32> to vector<8x324xf32>
    %87 = arith.select %84, %71, %86 : vector<8x324xi1>, vector<8x324xf32>
    %88 = arith.maximumf %68, %87 : vector<8x324xf32>
    %c0_25 = arith.constant 0 : index
    %c0_26 = arith.constant 0 : index
    %89 = vector.load %arg5[%c0_25, %c0_26] : memref<16x8xf32, #tpu.memory_space<vmem>>, vector<16x8xf32>
    %cst_27 = arith.constant dense<0.000000e+00> : vector<16x324xf32>
    %90 = tpu.matmul %89, %88, %cst_27 {dimension_numbers = #tpu.dot_dimension_numbers<[1], [0], [0], [1], [0, 0, 1, 1], [], []>} : vector<16x8xf32>, vector<8x324xf32>, vector<16x324xf32> -> vector<16x324xf32>
    %c0_28 = arith.constant 0 : index
    %c0_29 = arith.constant 0 : index
    %91 = vector.load %arg6[%c0_28, %c0_29] : memref<16x1xf32, #tpu.memory_space<vmem>>, vector<16x1xf32>
    %92 = vector.broadcast %91 : vector<16x1xf32> to vector<16x324xf32>
    %93 = arith.addf %90, %92 : vector<16x324xf32>
    %cst_30 = arith.constant 0.000000e+00 : f32
    %94 = vector.broadcast %cst_30 : f32 to vector<16x324xf32>
    %95 = arith.maximumf %93, %94 : vector<16x324xf32>
    %c0_31 = arith.constant 0 : index
    %c0_32 = arith.constant 0 : index
    %96 = vector.load %arg6[%c0_31, %c0_32] : memref<16x1xf32, #tpu.memory_space<vmem>>, vector<16x1xf32>
    %cst_33 = arith.constant 0.000000e+00 : f32
    %97 = vector.broadcast %cst_33 : f32 to vector<16x1xf32>
    %98 = arith.maximumf %96, %97 : vector<16x1xf32>
    %c0_i32_34 = arith.constant 0 : i32
    %99 = vector.broadcast %c0_i32_34 : i32 to vector<1x324xi32>
    %100 = arith.cmpi sge, %0, %99 : vector<1x324xi32>
    %c17_i32_35 = arith.constant 17 : i32
    %101 = vector.broadcast %c17_i32_35 : i32 to vector<1x324xi32>
    %102 = arith.cmpi slt, %0, %101 : vector<1x324xi32>
    %103 = arith.andi %100, %102 : vector<1x324xi1>
    %c0_i32_36 = arith.constant 0 : i32
    %104 = vector.broadcast %c0_i32_36 : i32 to vector<1x324xi32>
    %105 = arith.cmpi sge, %1, %104 : vector<1x324xi32>
    %106 = arith.andi %103, %105 : vector<1x324xi1>
    %c17_i32_37 = arith.constant 17 : i32
    %107 = vector.broadcast %c17_i32_37 : i32 to vector<1x324xi32>
    %108 = arith.cmpi slt, %1, %107 : vector<1x324xi32>
    %109 = arith.andi %106, %108 : vector<1x324xi1>
    %110 = vector.shape_cast %109 : vector<1x324xi1> to vector<1x324xi1>
    %111 = vector.broadcast %110 : vector<1x324xi1> to vector<16x324xi1>
    %112 = vector.shape_cast %98 : vector<16x1xf32> to vector<16x1xf32>
    %113 = vector.broadcast %112 : vector<16x1xf32> to vector<16x324xf32>
    %114 = arith.select %111, %95, %113 : vector<16x324xi1>, vector<16x324xf32>
    %115 = vector.extract_strided_slice %95 {offsets = [0, 323], sizes = [16, 1], strides = [1, 1]} : vector<16x324xf32> to vector<16x1xf32>
    %116 = vector.extract_strided_slice %95 {offsets = [0, 0], sizes = [16, 323], strides = [1, 1]} : vector<16x324xf32> to vector<16x323xf32>
    %117 = tpu.concatenate %115, %116 in 1 : vector<16x1xf32>, vector<16x323xf32> -> vector<16x324xf32>
    %c0_i32_38 = arith.constant 0 : i32
    %118 = vector.broadcast %c0_i32_38 : i32 to vector<1x324xi32>
    %119 = arith.cmpi sge, %0, %118 : vector<1x324xi32>
    %c17_i32_39 = arith.constant 17 : i32
    %120 = vector.broadcast %c17_i32_39 : i32 to vector<1x324xi32>
    %121 = arith.cmpi slt, %0, %120 : vector<1x324xi32>
    %122 = arith.andi %119, %121 : vector<1x324xi1>
    %c1_i32_40 = arith.constant 1 : i32
    %123 = vector.broadcast %c1_i32_40 : i32 to vector<1x324xi32>
    %124 = arith.cmpi sge, %1, %123 : vector<1x324xi32>
    %125 = arith.andi %122, %124 : vector<1x324xi1>
    %c18_i32 = arith.constant 18 : i32
    %126 = vector.broadcast %c18_i32 : i32 to vector<1x324xi32>
    %127 = arith.cmpi slt, %1, %126 : vector<1x324xi32>
    %128 = arith.andi %125, %127 : vector<1x324xi1>
    %129 = vector.shape_cast %128 : vector<1x324xi1> to vector<1x324xi1>
    %130 = vector.broadcast %129 : vector<1x324xi1> to vector<16x324xi1>
    %131 = vector.shape_cast %98 : vector<16x1xf32> to vector<16x1xf32>
    %132 = vector.broadcast %131 : vector<16x1xf32> to vector<16x324xf32>
    %133 = arith.select %130, %117, %132 : vector<16x324xi1>, vector<16x324xf32>
    %134 = arith.maximumf %114, %133 : vector<16x324xf32>
    %135 = vector.extract_strided_slice %95 {offsets = [0, 306], sizes = [16, 18], strides = [1, 1]} : vector<16x324xf32> to vector<16x18xf32>
    %136 = vector.extract_strided_slice %95 {offsets = [0, 0], sizes = [16, 306], strides = [1, 1]} : vector<16x324xf32> to vector<16x306xf32>
    %137 = tpu.concatenate %135, %136 in 1 : vector<16x18xf32>, vector<16x306xf32> -> vector<16x324xf32>
    %c1_i32_41 = arith.constant 1 : i32
    %138 = vector.broadcast %c1_i32_41 : i32 to vector<1x324xi32>
    %139 = arith.cmpi sge, %0, %138 : vector<1x324xi32>
    %c18_i32_42 = arith.constant 18 : i32
    %140 = vector.broadcast %c18_i32_42 : i32 to vector<1x324xi32>
    %141 = arith.cmpi slt, %0, %140 : vector<1x324xi32>
    %142 = arith.andi %139, %141 : vector<1x324xi1>
    %c0_i32_43 = arith.constant 0 : i32
    %143 = vector.broadcast %c0_i32_43 : i32 to vector<1x324xi32>
    %144 = arith.cmpi sge, %1, %143 : vector<1x324xi32>
    %145 = arith.andi %142, %144 : vector<1x324xi1>
    %c17_i32_44 = arith.constant 17 : i32
    %146 = vector.broadcast %c17_i32_44 : i32 to vector<1x324xi32>
    %147 = arith.cmpi slt, %1, %146 : vector<1x324xi32>
    %148 = arith.andi %145, %147 : vector<1x324xi1>
    %149 = vector.shape_cast %148 : vector<1x324xi1> to vector<1x324xi1>
    %150 = vector.broadcast %149 : vector<1x324xi1> to vector<16x324xi1>
    %151 = vector.shape_cast %98 : vector<16x1xf32> to vector<16x1xf32>
    %152 = vector.broadcast %151 : vector<16x1xf32> to vector<16x324xf32>
    %153 = arith.select %150, %137, %152 : vector<16x324xi1>, vector<16x324xf32>
    %154 = arith.maximumf %134, %153 : vector<16x324xf32>
    %155 = vector.extract_strided_slice %95 {offsets = [0, 305], sizes = [16, 19], strides = [1, 1]} : vector<16x324xf32> to vector<16x19xf32>
    %156 = vector.extract_strided_slice %95 {offsets = [0, 0], sizes = [16, 305], strides = [1, 1]} : vector<16x324xf32> to vector<16x305xf32>
    %157 = tpu.concatenate %155, %156 in 1 : vector<16x19xf32>, vector<16x305xf32> -> vector<16x324xf32>
    %c1_i32_45 = arith.constant 1 : i32
    %158 = vector.broadcast %c1_i32_45 : i32 to vector<1x324xi32>
    %159 = arith.cmpi sge, %0, %158 : vector<1x324xi32>
    %c18_i32_46 = arith.constant 18 : i32
    %160 = vector.broadcast %c18_i32_46 : i32 to vector<1x324xi32>
    %161 = arith.cmpi slt, %0, %160 : vector<1x324xi32>
    %162 = arith.andi %159, %161 : vector<1x324xi1>
    %c1_i32_47 = arith.constant 1 : i32
    %163 = vector.broadcast %c1_i32_47 : i32 to vector<1x324xi32>
    %164 = arith.cmpi sge, %1, %163 : vector<1x324xi32>
    %165 = arith.andi %162, %164 : vector<1x324xi1>
    %c18_i32_48 = arith.constant 18 : i32
    %166 = vector.broadcast %c18_i32_48 : i32 to vector<1x324xi32>
    %167 = arith.cmpi slt, %1, %166 : vector<1x324xi32>
    %168 = arith.andi %165, %167 : vector<1x324xi1>
    %169 = vector.shape_cast %168 : vector<1x324xi1> to vector<1x324xi1>
    %170 = vector.broadcast %169 : vector<1x324xi1> to vector<16x324xi1>
    %171 = vector.shape_cast %98 : vector<16x1xf32> to vector<16x1xf32>
    %172 = vector.broadcast %171 : vector<16x1xf32> to vector<16x324xf32>
    %173 = arith.select %170, %157, %172 : vector<16x324xi1>, vector<16x324xf32>
    %174 = arith.maximumf %154, %173 : vector<16x324xf32>
    %c0_49 = arith.constant 0 : index
    %c0_50 = arith.constant 0 : index
    %c0_51 = arith.constant 0 : index
    %175 = vector.load %arg7[%c0_49, %c0_50, %c0_51] : memref<8x324x32xbf16, #tpu.memory_space<vmem>>, vector<1x324x32xbf16>
    %176 = vector.shape_cast %175 : vector<1x324x32xbf16> to vector<324x32xbf16>
    %177 = arith.extf %176 : vector<324x32xbf16> to vector<324x32xf32>
    %178 = vector.extract_strided_slice %174 {offsets = [0, 0], sizes = [2, 324], strides = [1, 1]} : vector<16x324xf32> to vector<2x324xf32>
    %cst_52 = arith.constant dense<0.000000e+00> : vector<2x32xf32>
    %179 = tpu.matmul %178, %177, %cst_52 {dimension_numbers = #tpu.dot_dimension_numbers<[1], [0], [0], [1], [0, 0, 1, 1], [], []>} : vector<2x324xf32>, vector<324x32xf32>, vector<2x32xf32> -> vector<2x32xf32>
    %c1 = arith.constant 1 : index
    %c0_53 = arith.constant 0 : index
    %c0_54 = arith.constant 0 : index
    %180 = vector.load %arg7[%c1, %c0_53, %c0_54] : memref<8x324x32xbf16, #tpu.memory_space<vmem>>, vector<1x324x32xbf16>
    %181 = vector.shape_cast %180 : vector<1x324x32xbf16> to vector<324x32xbf16>
    %182 = arith.extf %181 : vector<324x32xbf16> to vector<324x32xf32>
    %183 = vector.extract_strided_slice %174 {offsets = [2, 0], sizes = [2, 324], strides = [1, 1]} : vector<16x324xf32> to vector<2x324xf32>
    %cst_55 = arith.constant dense<0.000000e+00> : vector<2x32xf32>
    %184 = tpu.matmul %183, %182, %cst_55 {dimension_numbers = #tpu.dot_dimension_numbers<[1], [0], [0], [1], [0, 0, 1, 1], [], []>} : vector<2x324xf32>, vector<324x32xf32>, vector<2x32xf32> -> vector<2x32xf32>
    %185 = arith.addf %179, %184 : vector<2x32xf32>
    %c2 = arith.constant 2 : index
    %c0_56 = arith.constant 0 : index
    %c0_57 = arith.constant 0 : index
    %186 = vector.load %arg7[%c2, %c0_56, %c0_57] : memref<8x324x32xbf16, #tpu.memory_space<vmem>>, vector<1x324x32xbf16>
    %187 = vector.shape_cast %186 : vector<1x324x32xbf16> to vector<324x32xbf16>
    %188 = arith.extf %187 : vector<324x32xbf16> to vector<324x32xf32>
    %189 = vector.extract_strided_slice %174 {offsets = [4, 0], sizes = [2, 324], strides = [1, 1]} : vector<16x324xf32> to vector<2x324xf32>
    %cst_58 = arith.constant dense<0.000000e+00> : vector<2x32xf32>
    %190 = tpu.matmul %189, %188, %cst_58 {dimension_numbers = #tpu.dot_dimension_numbers<[1], [0], [0], [1], [0, 0, 1, 1], [], []>} : vector<2x324xf32>, vector<324x32xf32>, vector<2x32xf32> -> vector<2x32xf32>
    %191 = arith.addf %185, %190 : vector<2x32xf32>
    %c3 = arith.constant 3 : index
    %c0_59 = arith.constant 0 : index
    %c0_60 = arith.constant 0 : index
    %192 = vector.load %arg7[%c3, %c0_59, %c0_60] : memref<8x324x32xbf16, #tpu.memory_space<vmem>>, vector<1x324x32xbf16>
    %193 = vector.shape_cast %192 : vector<1x324x32xbf16> to vector<324x32xbf16>
    %194 = arith.extf %193 : vector<324x32xbf16> to vector<324x32xf32>
    %195 = vector.extract_strided_slice %174 {offsets = [6, 0], sizes = [2, 324], strides = [1, 1]} : vector<16x324xf32> to vector<2x324xf32>
    %cst_61 = arith.constant dense<0.000000e+00> : vector<2x32xf32>
    %196 = tpu.matmul %195, %194, %cst_61 {dimension_numbers = #tpu.dot_dimension_numbers<[1], [0], [0], [1], [0, 0, 1, 1], [], []>} : vector<2x324xf32>, vector<324x32xf32>, vector<2x32xf32> -> vector<2x32xf32>
    %197 = arith.addf %191, %196 : vector<2x32xf32>
    %c4 = arith.constant 4 : index
    %c0_62 = arith.constant 0 : index
    %c0_63 = arith.constant 0 : index
    %198 = vector.load %arg7[%c4, %c0_62, %c0_63] : memref<8x324x32xbf16, #tpu.memory_space<vmem>>, vector<1x324x32xbf16>
    %199 = vector.shape_cast %198 : vector<1x324x32xbf16> to vector<324x32xbf16>
    %200 = arith.extf %199 : vector<324x32xbf16> to vector<324x32xf32>
    %201 = vector.extract_strided_slice %174 {offsets = [8, 0], sizes = [2, 324], strides = [1, 1]} : vector<16x324xf32> to vector<2x324xf32>
    %cst_64 = arith.constant dense<0.000000e+00> : vector<2x32xf32>
    %202 = tpu.matmul %201, %200, %cst_64 {dimension_numbers = #tpu.dot_dimension_numbers<[1], [0], [0], [1], [0, 0, 1, 1], [], []>} : vector<2x324xf32>, vector<324x32xf32>, vector<2x32xf32> -> vector<2x32xf32>
    %203 = arith.addf %197, %202 : vector<2x32xf32>
    %c5 = arith.constant 5 : index
    %c0_65 = arith.constant 0 : index
    %c0_66 = arith.constant 0 : index
    %204 = vector.load %arg7[%c5, %c0_65, %c0_66] : memref<8x324x32xbf16, #tpu.memory_space<vmem>>, vector<1x324x32xbf16>
    %205 = vector.shape_cast %204 : vector<1x324x32xbf16> to vector<324x32xbf16>
    %206 = arith.extf %205 : vector<324x32xbf16> to vector<324x32xf32>
    %207 = vector.extract_strided_slice %174 {offsets = [10, 0], sizes = [2, 324], strides = [1, 1]} : vector<16x324xf32> to vector<2x324xf32>
    %cst_67 = arith.constant dense<0.000000e+00> : vector<2x32xf32>
    %208 = tpu.matmul %207, %206, %cst_67 {dimension_numbers = #tpu.dot_dimension_numbers<[1], [0], [0], [1], [0, 0, 1, 1], [], []>} : vector<2x324xf32>, vector<324x32xf32>, vector<2x32xf32> -> vector<2x32xf32>
    %209 = arith.addf %203, %208 : vector<2x32xf32>
    %c6 = arith.constant 6 : index
    %c0_68 = arith.constant 0 : index
    %c0_69 = arith.constant 0 : index
    %210 = vector.load %arg7[%c6, %c0_68, %c0_69] : memref<8x324x32xbf16, #tpu.memory_space<vmem>>, vector<1x324x32xbf16>
    %211 = vector.shape_cast %210 : vector<1x324x32xbf16> to vector<324x32xbf16>
    %212 = arith.extf %211 : vector<324x32xbf16> to vector<324x32xf32>
    %213 = vector.extract_strided_slice %174 {offsets = [12, 0], sizes = [2, 324], strides = [1, 1]} : vector<16x324xf32> to vector<2x324xf32>
    %cst_70 = arith.constant dense<0.000000e+00> : vector<2x32xf32>
    %214 = tpu.matmul %213, %212, %cst_70 {dimension_numbers = #tpu.dot_dimension_numbers<[1], [0], [0], [1], [0, 0, 1, 1], [], []>} : vector<2x324xf32>, vector<324x32xf32>, vector<2x32xf32> -> vector<2x32xf32>
    %215 = arith.addf %209, %214 : vector<2x32xf32>
    %c7 = arith.constant 7 : index
    %c0_71 = arith.constant 0 : index
    %c0_72 = arith.constant 0 : index
    %216 = vector.load %arg7[%c7, %c0_71, %c0_72] : memref<8x324x32xbf16, #tpu.memory_space<vmem>>, vector<1x324x32xbf16>
    %217 = vector.shape_cast %216 : vector<1x324x32xbf16> to vector<324x32xbf16>
    %218 = arith.extf %217 : vector<324x32xbf16> to vector<324x32xf32>
    %219 = vector.extract_strided_slice %174 {offsets = [14, 0], sizes = [2, 324], strides = [1, 1]} : vector<16x324xf32> to vector<2x324xf32>
    %cst_73 = arith.constant dense<0.000000e+00> : vector<2x32xf32>
    %220 = tpu.matmul %219, %218, %cst_73 {dimension_numbers = #tpu.dot_dimension_numbers<[1], [0], [0], [1], [0, 0, 1, 1], [], []>} : vector<2x324xf32>, vector<324x32xf32>, vector<2x32xf32> -> vector<2x32xf32>
    %221 = arith.addf %215, %220 : vector<2x32xf32>
    %c0_74 = arith.constant 0 : index
    %c0_75 = arith.constant 0 : index
    %222 = vector.load %arg8[%c0_74, %c0_75] : memref<1x32xf32, #tpu.memory_space<vmem>>, vector<1x32xf32>
    %223 = vector.broadcast %222 : vector<1x32xf32> to vector<2x32xf32>
    %224 = arith.addf %221, %223 : vector<2x32xf32>
    %c0_76 = arith.constant 0 : index
    %c0_77 = arith.constant 0 : index
    %225 = vector.load %arg9[%c0_76, %c0_77] : memref<32x7xbf16, #tpu.memory_space<vmem>>, vector<32x7xbf16>
    %226 = arith.extf %225 : vector<32x7xbf16> to vector<32x7xf32>
    %cst_78 = arith.constant dense<0.000000e+00> : vector<2x7xf32>
    %227 = tpu.matmul %224, %226, %cst_78 {dimension_numbers = #tpu.dot_dimension_numbers<[1], [0], [0], [1], [0, 0, 1, 1], [], []>} : vector<2x32xf32>, vector<32x7xf32>, vector<2x7xf32> -> vector<2x7xf32>
    %c0_79 = arith.constant 0 : index
    %c0_80 = arith.constant 0 : index
    %228 = vector.load %arg10[%c0_79, %c0_80] : memref<1x7xf32, #tpu.memory_space<vmem>>, vector<1x7xf32>
    %229 = vector.broadcast %228 : vector<1x7xf32> to vector<2x7xf32>
    %230 = arith.addf %227, %229 : vector<2x7xf32>
    %c0_81 = arith.constant 0 : index
    %c0_82 = arith.constant 0 : index
    %231 = vector.load %arg11[%c0_81, %c0_82] : memref<2x7xf32, #tpu.memory_space<vmem>>, vector<2x7xf32>
    tpu.vector_store %arg11[%c0_81, %c0_82], %230 {strides = array<i32>} : memref<2x7xf32, #tpu.memory_space<vmem>>, vector<2x7xf32>,
    return
  }
}

</mosaic_0001>

<bundles_post_ra>
// kernel: convnet_forward.1
= control target key start
LH: loop header
LB: loop body
LE: loop exit
PB: predicated region body
PF: predicated region fallthrough
CT: control target
= control target key end

     0   :  { %v2982_v1 = vmov 0   ;;  %s4142_s0 = inlined_call_operand.vmem [shape: f32[2,324], index: 0, kind: input, shape index: {}]   ;;  %s4143_s1 = inlined_call_operand.vmem [shape: s32[1,324], index: 1, kind: input, shape index: {}]   ;;  %s4144_s2 = inlined_call_operand.vmem [shape: s32[1,324], index: 2, kind: input, shape index: {}]   ;;  %s4145_s3 = inlined_call_operand.vmem [shape: f32[8,2], index: 3, kind: input, shape index: {}]   ;;  %s4146_s4 = inlined_call_operand.vmem [shape: f32[8,1], index: 4, kind: input, shape index: {}]   ;;  %s4147_s5 = inlined_call_operand.vmem [shape: f32[16,8], index: 5, kind: input, shape index: {}]   ;;  %s4148_s6 = inlined_call_operand.vmem [shape: f32[16,1], index: 6, kind: input, shape index: {}]   ;;  %s4149_s7 = inlined_call_operand.vmem [shape: bf16[8,324,32], index: 7, kind: input, shape index: {}]   ;;  %s4150_s8 = inlined_call_operand.vmem [shape: f32[1,32], index: 8, kind: input, shape index: {}]   ;;  %s4151_s9 = inlined_call_operand.vmem [shape: bf16[32,7], index: 9, kind: input, shape index: {}]   ;;  %s4152_s10 = inlined_call_operand.vmem [shape: f32[1,7], index: 10, kind: input, shape index: {}]   ;;  %s4153_s11 = inlined_call_operand.hbm [shape: f32[2,7], index: 11, kind: output, shape index: {}]  }
   0x1   :  { %v41_v0 = vld [vmem:[%s4142_s0] sm:$0x3f]  ;;  %2936 = vset.pattern.permute.xlu0 %v2982_v1  ;;  %2937 = vset.pattern.permute.xlu1 %v2982_v1 }
   0x2   :  { %50 = vst [vmem:[#allocation1] ss:$4 sm:$0xff] %v41_v0  ;;  %v43_v2 = vld [vmem:[%s4146_s4] sm:$0xff]  ;;  %2953 = vset.pattern.permute.xlu2 %v2982_v1 }
   0x3   :  { %46 = vperm.xlu0 %2936, %v43_v2   ;;  %v128_v3 = vmax.f32 %v43_v2, 0.0 }
   0x4   :  { %16 = vsyncpa [#allocation3], 0  ;;  %vm58_vm0 = vcmask 1041408   ;;  %v42_v4 = vld [vmem:[%s4145_s3] sm:$0xff]  ;;  %vm54_vm1 = vcmask 15360   ;;  %s2983_s0 = smov 1  }
   0x5   :  { %145 = vperm.xlu1 %2937, %v128_v3   ;;  %s2984_s3 = smov 78   ;;  %s2985_s4 = smov 61   ;;  %v3092_v19 = vld [vmem:[%s4148_s6 + $0x8] sm:$0xff]  ;;  %v254_v20 = vld [vmem:[%s4148_s6] sm:$0xff]  ;;  %v2778_v57 = vld [vmem:[%s4149_s7 + $0x38] sm:$0xff]  }
   0x6   :  { %s2986_s23 = smov 19   ;;  %s2987_s24 = smov 79   ;;  %v348_v21 = vmax.f32 %v254_v20, 0.0  ;;  %v3101_v22 = vld [vmem:[%s4143_s1] sm:$0x7] }
   0x7   :  { %s2988_s25 = smov 18   ;;  %v3106_v23 = vld [vmem:[%s4144_s2] sm:$0x7]  ;;  %vm129_vm2 = vcmp.ge.s32.totalorder %v3101_v22, 0  ;;  %vm130_vm3 = vcmp.lt.s32.totalorder %v3101_v22, 16  ;;  %vm203_vm7 = vcmp.ge.s32.totalorder %v3101_v22, 1 }
   0x8   :  { %vm170_vm4 = vcmp.ge.s32.totalorder %v3106_v23, 1  ;;  %vm131_vm5 = vmand %vm129_vm2, %vm130_vm3  ;;  %vm132_vm6 = vcmp.ge.s32.totalorder %v3106_v23, 0  ;;  %vm204_vm8 = vcmp.lt.s32.totalorder %v3101_v22, 17  ;;  %vm172_vm10 = vcmp.lt.s32.totalorder %v3106_v23, 17  ;;  %s1815_s29 = sshll.u32 %s4153_s11, 4  ;;  %s1816_s29 = int_to_ptr.hbm [resolvable:$true] %s1815_s29 }
   0x9   :  { %v51_v5 = vld.sshfl [vmem:[#allocation1] sm:$0xff pattern:$0x73625140]  ;;  %v52_v6 = vld.sshfl [vmem:[#allocation1 + $0x8] sm:$0xff pattern:$0x73625140]  ;;  %vm171_vm9 = vmand %vm131_vm5, %vm170_vm4 }
   0xa   :  { %1824 = vmatpush.msk.msra.mxu0 %vm58_vm0, %v51_v5  ;;  %1826 = vmatpush.msk.msra.mxu1 %vm58_vm0, %v52_v6  ;;  %v53_v7 = vld.sshfl [vmem:[#allocation1 + $0x10] sm:$0xff pattern:$0x73625140]  ;;  %vm133_vm11 = vmand %vm131_vm5, %vm132_vm6  ;;  %vm134_vm12 = vcmp.lt.s32.totalorder %v3106_v23, 16 }
   0xb   :  { %1828 = vmatpush.msk.msra.mxu2 %vm58_vm0, %v53_v7  ;;  %1825 = vmatmul.msk.f32.vlgmr.msra.gmra.mxu0 %vm54_vm1, %v42_v4  ;;  %vm205_vm13 = vmand %vm203_vm7, %vm204_vm8 }
   0xc   :  { %1827 = vmatmul.msk.f32.vlgmr.msra.gmra.mxu1 %vm54_vm1, %v42_v4  ;;  %1829 = vmatmul.msk.f32.vlgmr.msra.gmra.mxu2 %vm54_vm1, %v42_v4  ;;  %vm173_vm14 = vmand %vm171_vm9, %vm172_vm10  ;;  %vm163_vm9 = vcmask 7168  }
   0xd   :  { %vm135_vm15 = vmand %vm133_vm11, %vm134_vm12  ;;  %v3133_v26 = vsel %vm173_vm14, 1, %v2982_v1  ;;  %vm4154_vm14 = vcmask 146432  }
   0xe   :  { %vm206_vm0 = vmand %vm205_vm13, %vm132_vm6  ;;  %v3136_v27 = vsel %vm135_vm15, 1, %v2982_v1  ;;  %v176_v28 = vperm.slane %v3133_v26, 1  ;;  %v175_v30 = vperm.slane %v3133_v26, 0  ;;  %v177_v2 = vperm.slane %v3133_v26, 2 }
   0xf   :  { %vm237_vm1 = vmand %vm205_vm13, %vm170_vm4  ;;  %v138_v29 = vperm.slane %v3136_v27, 1  ;;  %v137_v34 = vperm.slane %v3136_v27, 0  ;;  %v139_v6 = vperm.slane %v3136_v27, 2 }
  0x10   :  { %vm207_vm3 = vmand %vm206_vm0, %vm134_vm12  ;;  %vm3151_vm11 = vcmp.eq.s32.totalorder %v176_v28, 1  ;;  %vm3162_vm13 = vcmp.eq.s32.totalorder %v175_v30, 1  ;;  %v253_v28 = vld [vmem:[%s4147_s5 + $0x8] sm:$0xff] }
  0x11   :  { %vm238_vm5 = vmand %vm237_vm1, %vm172_vm10  ;;  %v3146_v31 = vsel %vm207_vm3, 1, %v2982_v1  ;;  %vm141_vm12 = vcmp.eq.s32.totalorder %v138_v29, 1  ;;  %vm140_vm15 = vcmp.eq.s32.totalorder %v137_v34, 1  ;;  %vm230_vm1 = vcmask 154624  }
  0x12   :  { %v3156_v38 = vsel %vm238_vm5, 1, %v2982_v1  ;;  %v210_v39 = vperm.slane %v3146_v31, 1  ;;  %v209_v47 = vperm.slane %v3146_v31, 0 }
  0x13   :  { %v241_v46 = vperm.slane %v3156_v38, 1  ;;  %v240_v53 = vperm.slane %v3156_v38, 0 }
  0x14   :  { %vm213_vm0 = vcmp.eq.s32.totalorder %v210_v39, 1  ;;  %vm3187_vm5 = vcmp.eq.s32.totalorder %v209_v47, 1 }
  0x15   :  { %vm3180_vm3 = vcmp.eq.s32.totalorder %v241_v46, 1 }
  0x75   :  { %v47_v8 = vpop.permute.xlu0 %46 }
  0x77   :  { %v3128_v25 = vpop.permute.xlu1 %145 }
  0x88   :  { %v82_v9 = vpop.f32.mrf.mxu0 }
  0x89   :  { %v3062_v10 = vadd.f32 %v82_v9, %v47_v8  ;;  %v102_v11 = vpop.f32.mrf.mxu1  ;;  %v252_v9 = vld [vmem:[%s4147_s5] sm:$0xff] }
  0x8a   :  { %v3064_v12 = vadd.f32 %v102_v11, %v47_v8 }
  0x8b   :  { %v125_v13 = vmax.f32 %v3062_v10, 0.0 }
  0x8c   :  { %v126_v14 = vmax.f32 %v3064_v12, 0.0 }
  0x8d   :  { %v148_v56 = vsel %vm140_vm15, %v125_v13, %v3128_v25  ;;  %vm142_vm15 = vcmp.eq.s32.totalorder %v139_v6, 1  ;;  %v1876_v6 = vld [vmem:[%s4149_s7 + $0x144] sm:$0x3] }
  0x8e   :  { %v2938_v15 = vpack.i.bf16 %v126_v14, %v125_v13  ;;  %v149_v50 = vsel %vm141_vm12, %v126_v14, %v3128_v25  ;;  %vm266_vm12 = vcmask 64512  }
  0x8f   :  { %v122_v16 = vpop.f32.mrf.mxu2 }
  0x90   :  { %v123_v17 = vadd.f32 %v122_v16, %v47_v8  ;;  %2939 = vrot.lane.b32.xlu1 %v2938_v15, %s2983_s0  ;;  %v242_v16 = vperm.slane %v3156_v38, 2 }
  0x92   :  { %v3073_v18 = vmax.f32 %v123_v17, 0.0 }
  0x94   :  { %187 = vrot.lane.b32.xlu2 %v3073_v18, %s2984_s3  ;;  %152 = vrot.lane.b32.xlu0 %v3073_v18, %s2985_s4 }
  0x98   :  { %2949 = vrot.lane.b32.xlu1 %v2938_v15, %s2986_s23 }
  0x9c   :  { %221 = vrot.lane.b32.xlu0 %v3073_v18, %s2987_s24  ;;  %2944 = vrot.lane.b32.xlu2 %v2938_v15, %s2988_s25  ;;  %v211_v15 = vperm.slane %v3146_v31, 2 }
  0xa0   :  { %228 = vrot.lane.b32.xlu1 %v3073_v18, %s2986_s23 }
  0xa4   :  { %194 = vrot.lane.b32.xlu0 %v3073_v18, %s2988_s25  ;;  %161 = vrot.lane.b32.xlu2 %v3073_v18, %s2983_s0 }
  0xac   :  { %263 = vperm.xlu0 %2936, %v3092_v19   ;;  %258 = vperm.xlu2 %2953, %v254_v20  }
  0xb4   :  { %362 = vperm.xlu0 %2936, %v348_v21  }
  0xee   :  { %v188_v24 = vpop.permute.xlu2 %187 }
  0xf6   :  { %v3148_v32 = vpop.permute.xlu2 %2944 }
  0xf7   :  { %v2947_v40 = vunpack.i.h.bf16 %v3148_v32  ;;  %v2946_v41 = vunpack.i.l.bf16 %v3148_v32 }
  0xf9   :  { %v197_v51 = vsel %vm4154_vm14, %v2946_v41, %v2947_v40  ;;  %v202_v61 = vsel %vm4154_vm14, %v188_v24, %v2946_v41  ;;  %v150_v24 = vsel %vm142_vm15, %v3073_v18, %v3128_v25 }
  0xfa   :  { %v216_v62 = vsel %vm213_vm0, %v197_v51, %v3128_v25  ;;  %v215_v5 = vsel %vm3187_vm5, %v202_v61, %v3128_v25  ;;  %vm214_vm0 = vcmp.eq.s32.totalorder %v211_v15, 1  ;;  %vm714_vm5 = vcmask 1043456  }
  0xfe   :  { %v162_v11 = vpop.permute.xlu2 %161 }
 0x102   :  { %v2940_v33 = vpop.permute.xlu1 %2939 }
 0x103   :  { %v2942_v35 = vunpack.i.h.bf16 %v2940_v33  ;;  %v2941_v36 = vunpack.i.l.bf16 %v2940_v33 }
 0x105   :  { %v164_v42 = vsel %vm163_vm9, %v2941_v36, %v2942_v35  ;;  %v165_v13 = vsel %vm163_vm9, %v2942_v35, %v162_v11 }
 0x106   :  { %v153_v44 = vpop.permute.xlu0 %152  ;;  %v182_v45 = vsel %vm3151_vm11, %v164_v42, %v3128_v25  ;;  %vm243_vm11 = vcmp.eq.s32.totalorder %v240_v53, 1  ;;  %v259_v18 = vpop.permute.xlu2 %258  ;;  %v349_v53 = vmax.f32 %v3092_v19, 0.0  ;;  %v2805_v19 = vld [vmem:[%s4149_s7 + $0x118] sm:$0xff]  }
 0x107   :  { %v169_v48 = vsel %vm163_vm9, %v153_v44, %v2941_v36  ;;  %v185_v52 = vmax.f32 %v149_v50, %v182_v45  ;;  %v2279_v55 = vunpack.c.h.bf16 %v2805_v19 }
 0x108   :  { %v181_v49 = vsel %vm3162_vm13, %v169_v48, %v3128_v25  ;;  %vm180_vm13 = vcmp.eq.s32.totalorder %v177_v2, 1  ;;  %v2803_v2 = vld [vmem:[%s4149_s7 + $0x108] sm:$0xff]  }
 0x109   :  { %v184_v60 = vmax.f32 %v148_v56, %v181_v49  ;;  %v219_v63 = vmax.f32 %v185_v52, %v216_v62  ;;  %v183_v20 = vsel %vm180_vm13, %v165_v13, %v3128_v25  ;;  %v3265_v49 = vld [vmem:[%s4149_s7 + $0x120] sm:$0xff]   ;;  %v2278_v56 = vunpack.c.l.bf16 %v2805_v19  ;;  %v2809_v13 = vld [vmem:[%s4149_s7 + $0x138] sm:$0xff]  }
 0x10a   :  { %v2950_v54 = vpop.permute.xlu1 %2949  ;;  %v186_v29 = vmax.f32 %v150_v24, %v183_v20  ;;  %v2282_v50 = vunpack.c.l.bf16 %v3265_v49  ;;  %v2170_v62 = vunpack.c.l.bf16 %v2778_v57  ;;  %v2295_v20 = vunpack.c.h.bf16 %v2809_v13  ;;  %v2801_v24 = vld [vmem:[%s4149_s7 + $0xf8] sm:$0xff]  }
 0x10b   :  { %v2952_v58 = vunpack.i.h.bf16 %v2950_v54  ;;  %v2951_v59 = vunpack.i.l.bf16 %v2950_v54  ;;  %v218_v10 = vmax.f32 %v184_v60, %v215_v5  ;;  %v2171_v60 = vunpack.c.h.bf16 %v2778_v57 }
 0x10c   :  { %v2270_v5 = vunpack.c.l.bf16 %v2803_v2 }
 0x10d   :  { %v231_v0 = vsel %vm230_vm1, %v2951_v59, %v2952_v58 }
 0x10e   :  { %v222_v3 = vpop.permute.xlu0 %221  ;;  %v247_v4 = vsel %vm3180_vm3, %v231_v0, %v3128_v25  ;;  %vm245_vm3 = vcmp.eq.s32.totalorder %v242_v16, 1 }
 0x10f   :  { %v236_v7 = vsel %vm230_vm1, %v222_v3, %v2951_v59  ;;  %v250_v8 = vmax.f32 %v219_v63, %v247_v4  ;;  %v2777_v59 = vld [vmem:[%s4149_s7 + $0x30] sm:$0xff]   ;;  %v2271_v3 = vunpack.c.h.bf16 %v2803_v2 }
 0x110   :  { %v246_v12 = vsel %vm243_vm11, %v236_v7, %v3128_v25  ;;  %v2167_v0 = vunpack.c.h.bf16 %v2777_v59  ;;  %v2166_v4 = vunpack.c.l.bf16 %v2777_v59  ;;  %v2776_v7 = vld [vmem:[%s4149_s7 + $0x28] sm:$0xff]   ;;  %vm464_vm11 = vcmp.lt.s32.totalorder %v3101_v22, 18 }
 0x111   :  { %311 = vmatpush.msrb.mxu0 %v250_v8  ;;  %v249_v14 = vmax.f32 %v218_v10, %v246_v12  ;;  %v2802_v8 = vld [vmem:[%s4149_s7 + $0x100] sm:$0xff]   ;;  %v2163_v10 = vunpack.c.h.bf16 %v2776_v7  ;;  %v2162_v16 = vunpack.c.l.bf16 %v2776_v7  ;;  %v2785_v7 = vld [vmem:[%s4149_s7 + $0x70] sm:$0xff]   ;;  %vm3488_vm13 = vmand %vm203_vm7, %vm464_vm11 }
 0x112   :  { %1832 = vmatmul.msk.f32.vlgmr.msrb.gmra.mxu0 %vm266_vm12, %v252_v9  ;;  %v229_v17 = vpop.permute.xlu1 %228  ;;  %v2267_v11 = vunpack.c.h.bf16 %v2802_v8  ;;  %v1875_v12 = vld [vmem:[%s4149_s7 + $0x140] sm:$0xf]  ;;  %vm466_vm7 = vmand %vm3488_vm13, %vm132_vm6 }
 0x113   :  { %288 = vmatpush.msra.mxu3 %v249_v14  ;;  %v232_v26 = vsel %vm230_vm1, %v2952_v58, %v229_v17  ;;  %v2804_v58 = vld [vmem:[%s4149_s7 + $0x110] sm:$0xff]   ;;  %v2775_v14 = vld [vmem:[%s4149_s7 + $0x20] sm:$0xff]   ;;  %v701_v15 = vunpack.c.l.bf16 %v1875_v12  ;;  %v2266_v17 = vunpack.c.l.bf16 %v2802_v8  ;;  %v2199_v12 = vunpack.c.h.bf16 %v2785_v7 }
 0x114   :  { %1830 = vmatmul.msk.f32.vlgmr.msra.gmra.mxu3 %vm266_vm12, %v252_v9  ;;  %v248_v32 = vsel %vm245_vm3, %v232_v26, %v3128_v25  ;;  %v2275_v61 = vunpack.c.h.bf16 %v2804_v58  ;;  %v2274_v63 = vunpack.c.l.bf16 %v2804_v58  ;;  %v2263_v26 = vunpack.c.h.bf16 %v2801_v24  ;;  %vm467_vm3 = vmand %vm466_vm7, %vm172_vm10 }
 0x115   :  { %738 = vmatpush.msrb.mxu3 %v2282_v50  ;;  %v2283_v58 = vunpack.c.h.bf16 %v3265_v49 }
 0x116   :  { %v195_v21 = vpop.permute.xlu0 %194 }
 0x117   :  { %v198_v27 = vsel %vm4154_vm14, %v2947_v40, %v195_v21  ;;  %739 = vmatpush.msrb.mxu3 %v2279_v55  ;;  %v2159_v21 = vunpack.c.h.bf16 %v2775_v14 }
 0x118   :  { %v217_v30 = vsel %vm214_vm0, %v198_v27, %v3128_v25  ;;  %v2294_v27 = vunpack.c.l.bf16 %v2809_v13 }
 0x119   :  { %v220_v31 = vmax.f32 %v186_v29, %v217_v30  ;;  %740 = vmatpush.msrb.mxu3 %v2278_v56  ;;  %v3333_v29 = vld [vmem:[%s4149_s7 + $0xe0] sm:$0xff]   ;;  %v2808_v30 = vld [vmem:[%s4149_s7 + $0x130] sm:$0xff]  }
 0x11a   :  { %1833 = vmatmul.msk.f32.gmra.mxu0 %vm266_vm12, %v253_v28 }
 0x11b   :  { %v251_v33 = vmax.f32 %v220_v31, %v248_v32  ;;  %741 = vmatpush.msrb.mxu3 %v2275_v61  ;;  %v2774_v31 = vld [vmem:[%s4149_s7 + $0x18] sm:$0xff]   ;;  %v2250_v32 = vunpack.c.l.bf16 %v3333_v29  ;;  %v2772_v61 = vld [vmem:[%s4149_s7 + $0x8] sm:$0xff]  }
 0x11c   :  { %1831 = vmatmul.msk.f32.gmra.mxu3 %vm266_vm12, %v253_v28 }
 0x11d   :  { %334 = vmatpush.msrb.mxu1 %v251_v33  ;;  %742 = vmatpush.msrb.mxu3 %v2274_v63  ;;  %v2262_v33 = vunpack.c.l.bf16 %v2801_v24  ;;  %v2795_v63 = vld [vmem:[%s4149_s7 + $0xc8] sm:$0xff]  }
 0x11e   :  { %1834 = vmatmul.msk.f32.vlgmr.msrb.gmra.mxu1 %vm266_vm12, %v252_v9  ;;  %v264_v43 = vpop.permute.xlu0 %263  ;;  %v702_v9 = vunpack.c.l.bf16 %v1876_v6  ;;  %718 = vmatpush.msrb.mxu2 %v2250_v32  ;;  %v2239_v2 = vunpack.c.h.bf16 %v2795_v63  ;;  %v2146_v6 = vunpack.c.l.bf16 %v2772_v61  ;;  %v2793_v32 = vld [vmem:[%s4149_s7 + $0xb8] sm:$0xff]  }
 0x11f   :  { %783 = vmatpush.msra.mxu1 %v2171_v60  ;;  %743 = vmatpush.msrb.mxu3 %v2271_v3  ;;  %v2817_v3 = vld [vmem:[%s4149_s7 + $0x180] sm:$0xff]  }
 0x120   :  { %1877 = vmatpush.msk.msra.mxu0 %vm714_vm5, %v702_v9  ;;  %v2327_v9 = vunpack.c.h.bf16 %v2817_v3  ;;  %v2326_v13 = vunpack.c.l.bf16 %v2817_v3 }
 0x121   :  { %784 = vmatpush.msra.mxu1 %v2170_v62  ;;  %744 = vmatpush.msrb.mxu3 %v2270_v5  ;;  %v2786_v62 = vld [vmem:[%s4149_s7 + $0x78] sm:$0xff]   ;;  %v2251_v5 = vunpack.c.h.bf16 %v3333_v29 }
 0x122   :  { %766 = vmatpush.msra.mxu0 %v701_v15  ;;  %v2203_v49 = vunpack.c.h.bf16 %v2786_v62  ;;  %v2202_v8 = vunpack.c.l.bf16 %v2786_v62  ;;  %v2813_v62 = vld [vmem:[%s4149_s7 + $0x160] sm:$0xff]  }
 0x123   :  { %785 = vmatpush.msra.mxu1 %v2167_v0  ;;  %745 = vmatpush.msrb.mxu3 %v2267_v11  ;;  %v2147_v0 = vunpack.c.h.bf16 %v2772_v61 }
 0x124   :  { %767 = vmatpush.msra.mxu0 %v2295_v20  ;;  %v2825_v20 = vld [vmem:[%s4149_s7 + $0x1c0] sm:$0xff]  }
 0x125   :  { %786 = vmatpush.msra.mxu1 %v2166_v4  ;;  %746 = vmatpush.msrb.mxu3 %v2266_v17  ;;  %v2141_v4 = vld [vmem:[%s4149_s7] sm:$0xff]   ;;  %v2816_v17 = vld [vmem:[%s4149_s7 + $0x178] sm:$0xff]   ;;  %v2358_v29 = vunpack.c.l.bf16 %v2825_v20 }
 0x126   :  { %1835 = vmatmul.msk.f32.gmra.mxu1 %vm266_vm12, %v253_v28  ;;  %v2158_v28 = vunpack.c.l.bf16 %v2775_v14  ;;  %768 = vmatpush.msra.mxu0 %v2294_v27  ;;  %v2143_v11 = vunpack.c.h.bf16 %v2141_v4  ;;  %v2794_v14 = vld [vmem:[%s4149_s7 + $0xc0] sm:$0xff]   ;;  %v2323_v24 = vunpack.c.h.bf16 %v2816_v17  ;;  %vm3482_vm12 = vmand %vm129_vm2, %vm204_vm8  ;;  %vm413_vm8 = vcmp.lt.s32.totalorder %v3106_v23, 18  ;;  %v2049_v23 = vld [vmem:[%s4149_s7 + $0x3d0] sm:$0xf] }
 0x127   :  { %787 = vmatpush.msra.mxu1 %v2163_v10  ;;  %747 = vmatpush.msrb.mxu3 %v2263_v26  ;;  %v2238_v10 = vunpack.c.l.bf16 %v2795_v63  ;;  %v2235_v15 = vunpack.c.h.bf16 %v2794_v14  ;;  %v2359_v26 = vunpack.c.h.bf16 %v2825_v20  ;;  %v2234_v27 = vunpack.c.l.bf16 %v2794_v14  ;;  %v2822_v63 = vld [vmem:[%s4149_s7 + $0x1a8] sm:$0xff]   ;;  %v2790_v20 = vld [vmem:[%s4149_s7 + $0x98] sm:$0xff]   ;;  %vm412_vm2 = vmand %vm3482_vm12, %vm170_vm4 }
 0x128   :  { %vm414_vm15 = vmand %vm412_vm2, %vm413_vm8 }
 0x129   :  { %788 = vmatpush.msra.mxu1 %v2162_v16  ;;  %748 = vmatpush.msrb.mxu3 %v2262_v33  ;;  %v2142_v16 = vunpack.c.l.bf16 %v2141_v4  ;;  %v2231_v33 = vunpack.c.h.bf16 %v2793_v32  ;;  %v2781_v4 = vld [vmem:[%s4149_s7 + $0x50] sm:$0xff]   ;;  %vm351_vm0 = vmand %vm3482_vm12, %vm132_vm6 }
 0x12a   :  { %vm352_vm11 = vmand %vm351_vm0, %vm172_vm10 }
 0x12b   :  { %789 = vmatpush.msra.mxu1 %v2159_v21  ;;  %v2198_v21 = vunpack.c.l.bf16 %v2785_v7  ;;  %v2310_v7 = vunpack.c.l.bf16 %v2813_v62  ;;  %vm517_vm2 = vmand %vm3488_vm13, %vm170_vm4 }
 0x12c   :  { %vm518_vm6 = vmand %vm517_vm2, %vm413_vm8 }
 0x12d   :  { %790 = vmatpush.msra.mxu1 %v2158_v28  ;;  %v2784_v28 = vld [vmem:[%s4149_s7 + $0x68] sm:$0xff]  }
 0x18f   :  { %v313_v34 = vpop.f32.mrf.mxu0 }
 0x190   :  { %v314_v35 = vadd.f32 %v313_v34, %v259_v18  ;;  %v2155_v34 = vunpack.c.h.bf16 %v2774_v31 }
 0x192   :  { %v3226_v36 = vmax.f32 %v314_v35, 0.0  ;;  %v2797_v35 = vld [vmem:[%s4149_s7 + $0xd8] sm:$0xff]   ;;  %791 = vmatpush.msra.mxu1 %v2155_v34 }
 0x193   :  { %v2824_v34 = vld [vmem:[%s4149_s7 + $0x1b8] sm:$0xff]  }
 0x194   :  { %390 = vrot.lane.b32.xlu2 %v3226_v36, %s2983_s0  ;;  %495 = vrot.lane.b32.xlu1 %v3226_v36, %s2986_s23 }
 0x197   :  { %v290_v39 = vpop.f32.mrf.mxu3  ;;  %v316_v42 = vpop.f32.mrf.mxu0 }
 0x198   :  { %v291_v40 = vadd.f32 %v290_v39, %v259_v18  ;;  %v317_v44 = vadd.f32 %v316_v42, %v264_v43  ;;  %v2154_v42 = vunpack.c.l.bf16 %v2774_v31  ;;  %v2322_v31 = vunpack.c.l.bf16 %v2816_v17  ;;  %v2780_v17 = vld [vmem:[%s4149_s7 + $0x48] sm:$0xff]  }
 0x19a   :  { %v3242_v41 = vmax.f32 %v291_v40, 0.0  ;;  %v3254_v45 = vmax.f32 %v317_v44, 0.0  ;;  %v2290_v40 = vunpack.c.l.bf16 %v2808_v30  ;;  %v2773_v44 = vld [vmem:[%s4149_s7 + $0x10] sm:$0xff]   ;;  %792 = vmatpush.msra.mxu1 %v2154_v42 }
 0x19b   :  { %v336_v25 = vpop.f32.mrf.mxu1  ;;  %v2151_v50 = vunpack.c.h.bf16 %v2773_v44  ;;  %v2150_v57 = vunpack.c.l.bf16 %v2773_v44 }
 0x19c   :  { %v337_v37 = vadd.f32 %v336_v25, %v259_v18  ;;  %442 = vrot.lane.b32.xlu2 %v3226_v36, %s2988_s25  ;;  %v2291_v18 = vunpack.c.h.bf16 %v2808_v30  ;;  %v2800_v25 = vld [vmem:[%s4149_s7 + $0xf0] sm:$0xff]   ;;  %v2195_v30 = vunpack.c.h.bf16 %v2784_v28 }
 0x19d   :  { %v2259_v39 = vunpack.c.h.bf16 %v2800_v25  ;;  %793 = vmatpush.msra.mxu1 %v2151_v50  ;;  %v2823_v50 = vld [vmem:[%s4149_s7 + $0x1b0] sm:$0xff]  }
 0x19e   :  { %v3234_v38 = vmax.f32 %v337_v37, 0.0  ;;  %v2247_v37 = vunpack.c.h.bf16 %v2797_v35  ;;  %769 = vmatpush.msra.mxu0 %v2291_v18  ;;  %v2815_v18 = vld [vmem:[%s4149_s7 + $0x170] sm:$0xff]  }
 0x19f   :  { %v293_v48 = vpop.f32.mrf.mxu3  ;;  %749 = vmatpush.msrb.mxu3 %v2259_v39  ;;  %794 = vmatpush.msra.mxu1 %v2150_v57  ;;  %v2230_v39 = vunpack.c.l.bf16 %v2793_v32  ;;  %v2318_v44 = vunpack.c.l.bf16 %v2815_v18 }
 0x1a0   :  { %378 = vrot.lane.b32.xlu0 %v3234_v38, %s2985_s4  ;;  %444 = vrot.lane.b32.xlu1 %v3234_v38, %s2988_s25  ;;  %v294_v51 = vadd.f32 %v293_v48, %v264_v43 }
 0x1a1   :  { %719 = vmatpush.msrb.mxu2 %v2247_v37  ;;  %770 = vmatpush.msra.mxu0 %v2290_v40  ;;  %v2355_v37 = vunpack.c.h.bf16 %v2824_v34  ;;  %v2783_v40 = vld [vmem:[%s4149_s7 + $0x60] sm:$0xff]  }
 0x1a2   :  { %v3273_v54 = vmax.f32 %v294_v51, 0.0  ;;  %v2796_v51 = vld [vmem:[%s4149_s7 + $0xd0] sm:$0xff]   ;;  %795 = vmatpush.msra.mxu1 %v2147_v0  ;;  %v2191_v42 = vunpack.c.h.bf16 %v2783_v40 }
 0x1a3   :  { %v339_v46 = vpop.f32.mrf.mxu1  ;;  %v2243_v19 = vunpack.c.h.bf16 %v2796_v51  ;;  %v2242_v59 = vunpack.c.l.bf16 %v2796_v51  ;;  %v2190_v51 = vunpack.c.l.bf16 %v2783_v40 }
 0x1a4   :  { %392 = vrot.lane.b32.xlu2 %v3234_v38, %s2983_s0  ;;  %v340_v47 = vadd.f32 %v339_v46, %v264_v43  ;;  %v2807_v43 = vld [vmem:[%s4149_s7 + $0x128] sm:$0xff]   ;;  %v2246_v46 = vunpack.c.l.bf16 %v2797_v35  ;;  %796 = vmatpush.msra.mxu1 %v2146_v6  ;;  %v2194_v35 = vunpack.c.l.bf16 %v2784_v28  ;;  %v2346_v6 = vunpack.c.l.bf16 %v2822_v63  ;;  %v2811_v28 = vld [vmem:[%s4149_s7 + $0x150] sm:$0xff]  }
 0x1a5   :  { %v2287_v48 = vunpack.c.h.bf16 %v2807_v43  ;;  %v2286_v56 = vunpack.c.l.bf16 %v2807_v43  ;;  %v2354_v43 = vunpack.c.l.bf16 %v2824_v34  ;;  %v2303_v32 = vunpack.c.h.bf16 %v2811_v28  ;;  %v2779_v34 = vld [vmem:[%s4149_s7 + $0x40] sm:$0xff]  }
 0x1a6   :  { %v3268_v52 = vmax.f32 %v340_v47, 0.0  ;;  %v2258_v47 = vunpack.c.l.bf16 %v2800_v25  ;;  %720 = vmatpush.msrb.mxu2 %v2246_v46  ;;  %797 = vmatpush.msra.mxu1 %v2143_v11  ;;  %v2319_v25 = vunpack.c.h.bf16 %v2815_v18  ;;  %v2792_v46 = vld [vmem:[%s4149_s7 + $0xb0] sm:$0xff]   ;;  %v2812_v11 = vld [vmem:[%s4149_s7 + $0x158] sm:$0xff]  }
 0x1a7   :  { %771 = vmatpush.msra.mxu0 %v2287_v48  ;;  %v2814_v48 = vld [vmem:[%s4149_s7 + $0x168] sm:$0xff]  }
 0x1a8   :  { %493 = vrot.lane.b32.xlu0 %v3242_v41, %s2986_s23  ;;  %388 = vrot.lane.b32.xlu1 %v3242_v41, %s2983_s0 }
 0x1a9   :  { %750 = vmatpush.msrb.mxu3 %v2258_v47  ;;  %721 = vmatpush.msrb.mxu2 %v2243_v19  ;;  %v2227_v47 = vunpack.c.h.bf16 %v2792_v46  ;;  %v2351_v19 = vunpack.c.h.bf16 %v2823_v50 }
 0x1aa   :  { %772 = vmatpush.msra.mxu0 %v2286_v56  ;;  %798 = vmatpush.msra.mxu1 %v2142_v16  ;;  %v2782_v56 = vld [vmem:[%s4149_s7 + $0x58] sm:$0xff]  }
 0x1ab   :  { %722 = vmatpush.msrb.mxu2 %v2242_v59  ;;  %v2187_v57 = vunpack.c.h.bf16 %v2782_v56  ;;  %v2350_v59 = vunpack.c.l.bf16 %v2823_v50  ;;  %v2186_v0 = vunpack.c.l.bf16 %v2782_v56  ;;  %v3473_v56 = vpop.permute.xlu0 %362 }
 0x1ac   :  { %434 = vrot.lane.b32.xlu2 %v3234_v38, %s2984_s3  ;;  %773 = vmatpush.msra.mxu0 %v2283_v58  ;;  %v2314_v58 = vunpack.c.l.bf16 %v2814_v48 }
 0x1ad   :  { %723 = vmatpush.msrb.mxu2 %v2239_v2  ;;  %956 = vmatpush.msrb.mxu1 %v2359_v26  ;;  %v2347_v2 = vunpack.c.h.bf16 %v2822_v63  ;;  %v2306_v26 = vunpack.c.l.bf16 %v2812_v11 }
 0x1ae   :  { %803 = vmatpush.msrb.mxu0 %v2203_v49  ;;  %v2311_v49 = vunpack.c.h.bf16 %v2813_v62  ;;  %v2787_v62 = vld [vmem:[%s4149_s7 + $0x80] sm:$0xff]  }
 0x1af   :  { %724 = vmatpush.msrb.mxu2 %v2238_v10  ;;  %957 = vmatpush.msrb.mxu1 %v2358_v29  ;;  %v578_v10 = vld [vmem:[%s4149_s7 + $0xa0] sm:$0x3]  ;;  %v2820_v29 = vld [vmem:[%s4149_s7 + $0x198] sm:$0xff]   ;;  %v2207_v22 = vunpack.c.h.bf16 %v2787_v62 }
 0x1b0   :  { %497 = vrot.lane.b32.xlu0 %v3234_v38, %s2986_s23  ;;  %440 = vrot.lane.b32.xlu1 %v3242_v41, %s2988_s25  ;;  %v619_v14 = vunpack.c.l.bf16 %v578_v10  ;;  %v2339_v18 = vunpack.c.h.bf16 %v2820_v29  ;;  %v2338_v40 = vunpack.c.l.bf16 %v2820_v29 }
 0x1b1   :  { %804 = vmatpush.msrb.mxu0 %v2202_v8  ;;  %725 = vmatpush.msrb.mxu2 %v2235_v15  ;;  %v1836_v8 = vld [vmem:[%s4149_s7 + $0xa4] sm:$0xf]  ;;  %v2307_v15 = vunpack.c.h.bf16 %v2812_v11 }
 0x1b2   :  { %958 = vmatpush.msrb.mxu1 %v2355_v37 }
 0x1b3   :  { %805 = vmatpush.msrb.mxu0 %v2199_v12  ;;  %726 = vmatpush.msrb.mxu2 %v2234_v27  ;;  %v2821_v12 = vld [vmem:[%s4149_s7 + $0x1a0] sm:$0xff]  }
 0x1b4   :  { %448 = vrot.lane.b32.xlu2 %v3254_v45, %s2988_s25  ;;  %959 = vmatpush.msrb.mxu1 %v2354_v43  ;;  %v2343_v16 = vunpack.c.h.bf16 %v2821_v12  ;;  %v2342_v27 = vunpack.c.l.bf16 %v2821_v12  ;;  %v2819_v43 = vld [vmem:[%s4149_s7 + $0x190] sm:$0xff]  }
 0x1b5   :  { %806 = vmatpush.msrb.mxu0 %v2198_v21  ;;  %727 = vmatpush.msrb.mxu2 %v2231_v33  ;;  %v2179_v21 = vunpack.c.h.bf16 %v2780_v17 }
 0x1b6   :  { %960 = vmatpush.msrb.mxu1 %v2351_v19 }
 0x1b7   :  { %807 = vmatpush.msrb.mxu0 %v2195_v30  ;;  %728 = vmatpush.msrb.mxu2 %v2230_v39  ;;  %v2178_v30 = vunpack.c.l.bf16 %v2780_v17  ;;  %v2302_v39 = vunpack.c.l.bf16 %v2811_v28  ;;  %v519_v17 = vsel %vm518_vm6, 1, %v2982_v1  ;;  %vm711_vm6 = vcmask 556032  }
 0x1b8   :  { %396 = vrot.lane.b32.xlu0 %v3254_v45, %s2983_s0  ;;  %487 = vrot.lane.b32.xlu1 %v3234_v38, %s2987_s24  ;;  %v521_v29 = vperm.slane %v519_v17, 1 }
 0x1b9   :  { %808 = vmatpush.msrb.mxu0 %v2194_v35  ;;  %729 = vmatpush.msrb.mxu2 %v2227_v47  ;;  %v2789_v35 = vld [vmem:[%s4149_s7 + $0x90] sm:$0xff]  }
 0x1ba   :  { %961 = vmatpush.msrb.mxu1 %v2350_v59  ;;  %v2215_v37 = vunpack.c.h.bf16 %v2789_v35  ;;  %vm3579_vm0 = vcmp.eq.s32.totalorder %v521_v29, 1  ;;  %v1921_v29 = vld [vmem:[%s4149_s7 + $0x1e8] sm:$0x3] }
 0x1bb   :  { %809 = vmatpush.msrb.mxu0 %v2191_v42  ;;  %v2810_v42 = vld [vmem:[%s4149_s7 + $0x148] sm:$0xff]  }
 0x1bc   :  { %380 = vrot.lane.b32.xlu2 %v3268_v52, %s2985_s4  ;;  %962 = vmatpush.msrb.mxu1 %v2347_v2  ;;  %v2299_v47 = vunpack.c.h.bf16 %v2810_v42  ;;  %v2298_v19 = vunpack.c.l.bf16 %v2810_v42 }
 0x1bd   :  { %810 = vmatpush.msrb.mxu0 %v2190_v51  ;;  %v2788_v51 = vld [vmem:[%s4149_s7 + $0x88] sm:$0xff]  }
 0x1be   :  { %963 = vmatpush.msrb.mxu1 %v2346_v6  ;;  %v2210_v59 = vunpack.c.l.bf16 %v2788_v51 }
 0x1bf   :  { %811 = vmatpush.msrb.mxu0 %v2187_v57  ;;  %v2818_v57 = vld [vmem:[%s4149_s7 + $0x188] sm:$0xff]  }
 0x1c0   :  { %394 = vrot.lane.b32.xlu0 %v3273_v54, %s2983_s0  ;;  %367 = vperm.xlu1 %2937, %v349_v53   ;;  %v2799_v53 = vld [vmem:[%s4149_s7 + $0xe8] sm:$0xff]  }
 0x1c1   :  { %v2255_v55 = vunpack.c.h.bf16 %v2799_v53  ;;  %v2254_v60 = vunpack.c.l.bf16 %v2799_v53  ;;  %v2315_v53 = vunpack.c.h.bf16 %v2814_v48  ;;  %812 = vmatpush.msrb.mxu0 %v2186_v0  ;;  %964 = vmatpush.msrb.mxu1 %v2343_v16  ;;  %v2335_v48 = vunpack.c.h.bf16 %v2819_v43 }
 0x1c2   :  { %v2330_v0 = vunpack.c.l.bf16 %v2818_v57 }
 0x1c3   :  { %751 = vmatpush.msrb.mxu3 %v2255_v55  ;;  %v2226_v55 = vunpack.c.l.bf16 %v2792_v46  ;;  %965 = vmatpush.msrb.mxu1 %v2342_v27  ;;  %v2214_v46 = vunpack.c.l.bf16 %v2789_v35  ;;  %v522_v27 = vperm.slane %v519_v17, 2 }
 0x1c4   :  { %436 = vrot.lane.b32.xlu2 %v3268_v52, %s2984_s3 }
 0x1c5   :  { %752 = vmatpush.msrb.mxu3 %v2254_v60  ;;  %v2791_v60 = vld [vmem:[%s4149_s7 + $0xa8] sm:$0xff]   ;;  %730 = vmatpush.msrb.mxu2 %v2226_v55  ;;  %v2334_v55 = vunpack.c.l.bf16 %v2819_v43  ;;  %vm3571_vm7 = vcmp.eq.s32.totalorder %v522_v27, 1  ;;  %v2846_v43 = vld [vmem:[%s4149_s7 + $0x270] sm:$0xff]  }
 0x1c6   :  { %v2223_v61 = vunpack.c.h.bf16 %v2791_v60  ;;  %v2222_v3 = vunpack.c.l.bf16 %v2791_v60  ;;  %966 = vmatpush.msrb.mxu1 %v2339_v18  ;;  %v2331_v60 = vunpack.c.h.bf16 %v2818_v57 }
 0x1c7   :  { %753 = vmatpush.msrb.mxu3 %v2251_v5  ;;  %v2183_v5 = vunpack.c.h.bf16 %v2781_v4 }
 0x1c8   :  { %446 = vrot.lane.b32.xlu0 %v3273_v54, %s2988_s25  ;;  %489 = vrot.lane.b32.xlu1 %v3268_v52, %s2987_s24 }
 0x1c9   :  { %936 = vmatpush.msra.mxu3 %v2327_v9  ;;  %731 = vmatpush.msrb.mxu2 %v2223_v61  ;;  %v662_v9 = vunpack.c.l.bf16 %v1836_v8 }
 0x1ca   :  { %813 = vmatpush.msrb.mxu0 %v2183_v5  ;;  %967 = vmatpush.msrb.mxu1 %v2338_v40  ;;  %v468_v5 = vsel %vm467_vm3, 1, %v2982_v1 }
 0x1cb   :  { %937 = vmatpush.msra.mxu3 %v2326_v13  ;;  %732 = vmatpush.msrb.mxu2 %v2222_v3  ;;  %v2182_v13 = vunpack.c.l.bf16 %v2781_v4  ;;  %v415_v4 = vsel %vm414_vm15, 1, %v2982_v1  ;;  %v471_v10 = vperm.slane %v468_v5, 2  ;;  %v470_v28 = vperm.slane %v468_v5, 1 }
 0x1cc   :  { %499 = vrot.lane.b32.xlu2 %v3273_v54, %s2986_s23  ;;  %968 = vmatpush.msrb.mxu1 %v2335_v48  ;;  %v418_v6 = vperm.slane %v415_v4, 2  ;;  %v417_v11 = vperm.slane %v415_v4, 1 }
 0x1cd   :  { %938 = vmatpush.msra.mxu3 %v2323_v24  ;;  %v2219_v24 = vunpack.c.h.bf16 %v2790_v20  ;;  %733 = vmatpush.msrb.mxu2 %v662_v9  ;;  %vm3538_vm10 = vcmp.eq.s32.totalorder %v471_v10, 1  ;;  %vm3575_vm15 = vcmp.eq.s32.totalorder %v470_v28, 1 }
 0x1ce   :  { %814 = vmatpush.msrb.mxu0 %v2182_v13  ;;  %969 = vmatpush.msrb.mxu1 %v2334_v55  ;;  %vm3525_vm12 = vcmp.eq.s32.totalorder %v418_v6, 1  ;;  %vm3544_vm13 = vcmp.eq.s32.totalorder %v417_v11, 1  ;;  %v3598_v55 = vld [vmem:[%s4149_s7 + $0x228] sm:$0xff]   ;;  %v2844_v6 = vld [vmem:[%s4149_s7 + $0x260] sm:$0xff]  }
 0x1cf   :  { %939 = vmatpush.msra.mxu3 %v2322_v31  ;;  %1879 = vmatpush.msk.msra.mxu2 %vm714_vm5, %v619_v14  ;;  %v2218_v31 = vunpack.c.l.bf16 %v2790_v20  ;;  %v2863_v20 = vld [vmem:[%s4149_s7 + $0x300] sm:$0xff]  }
 0x1d0   :  { %450 = vrot.lane.b32.xlu0 %v3268_v52, %s2988_s25  ;;  %398 = vrot.lane.b32.xlu1 %v3268_v52, %s2983_s0  ;;  %v2510_v40 = vunpack.c.l.bf16 %v2863_v20  ;;  %s2989_s25 = smov [#allocation2]  }
 0x1d1   :  { %940 = vmatpush.msra.mxu3 %v2319_v25  ;;  %815 = vmatpush.msrb.mxu0 %v2179_v21  ;;  %v2175_v25 = vunpack.c.h.bf16 %v2779_v34  ;;  %s1813_s0 = sshll.u32 %s2989_s25, 4  ;;  %s1814_s0 = int_to_ptr.vmem [resolvable:$true] %s1813_s0 }
 0x1d2   :  { %831 = vmatpush.msra.mxu2 %v2219_v24  ;;  %970 = vmatpush.msrb.mxu1 %v2331_v60  ;;  %v2840_v24 = vld [vmem:[%s4149_s7 + $0x240] sm:$0xff]  }
 0x1d3   :  { %941 = vmatpush.msra.mxu3 %v2318_v44  ;;  %816 = vmatpush.msrb.mxu0 %v2178_v30  ;;  %v2174_v44 = vunpack.c.l.bf16 %v2779_v34 }
 0x1d4   :  { %503 = vrot.lane.b32.xlu2 %v3268_v52, %s2986_s23  ;;  %832 = vmatpush.msra.mxu2 %v2218_v31  ;;  %v416_v31 = vperm.slane %v415_v4, 0 }
 0x1d5   :  { %942 = vmatpush.msra.mxu3 %v2315_v53  ;;  %817 = vmatpush.msrb.mxu0 %v2175_v25  ;;  %v2211_v53 = vunpack.c.h.bf16 %v2788_v51  ;;  %v469_v25 = vperm.slane %v468_v5, 0 }
 0x1d6   :  { %833 = vmatpush.msra.mxu2 %v2215_v37  ;;  %971 = vmatpush.msrb.mxu1 %v2330_v0  ;;  %vm3586_vm3 = vcmp.eq.s32.totalorder %v416_v31, 1  ;;  %v3623_v0 = vld [vmem:[%s4149_s7 + $0x268] sm:$0xff]  }
 0x1d7   :  { %943 = vmatpush.msra.mxu3 %v2314_v58  ;;  %818 = vmatpush.msrb.mxu0 %v2174_v44  ;;  %vm3607_vm2 = vcmp.eq.s32.totalorder %v469_v25, 1  ;;  %v2438_v10 = vunpack.c.l.bf16 %v3623_v0  ;;  %v925_v25 = vunpack.c.l.bf16 %v1921_v29 }
 0x1d8   :  { %501 = vrot.lane.b32.xlu1 %v3254_v45, %s2986_s23  ;;  %834 = vmatpush.msra.mxu2 %v2214_v46  ;;  %v2407_v46 = vunpack.c.h.bf16 %v3598_v55 }
 0x1d9   :  { %944 = vmatpush.msra.mxu3 %v2311_v49  ;;  %v2206_v49 = vunpack.c.l.bf16 %v2787_v62 }
 0x1da   :  { %835 = vmatpush.msra.mxu2 %v2211_v53 }
 0x1db   :  { %945 = vmatpush.msra.mxu3 %v2310_v7  ;;  %v353_v7 = vsel %vm352_vm11, 1, %v2982_v1 }
 0x1dc   :  { %836 = vmatpush.msra.mxu2 %v2210_v59  ;;  %v356_v9 = vperm.slane %v353_v7, 2  ;;  %v354_v35 = vperm.slane %v353_v7, 0 }
 0x1dd   :  { %946 = vmatpush.msra.mxu3 %v2307_v15  ;;  %v355_v15 = vperm.slane %v353_v7, 1 }
 0x1de   :  { %837 = vmatpush.msra.mxu2 %v2207_v22  ;;  %vm3534_vm4 = vcmp.eq.s32.totalorder %v356_v9, 1  ;;  %vm3600_vm11 = vcmp.eq.s32.totalorder %v354_v35, 1  ;;  %v2836_v22 = vld [vmem:[%s4149_s7 + $0x220] sm:$0xff]   ;;  %v2843_v35 = vld [vmem:[%s4149_s7 + $0x258] sm:$0xff]  }
 0x1df   :  { %947 = vmatpush.msra.mxu3 %v2306_v26  ;;  %vm3553_vm8 = vcmp.eq.s32.totalorder %v355_v15, 1  ;;  %v370_v7 = vsel %vm3600_vm11, %v3242_v41, %v3473_v56  ;;  %v2403_v9 = vunpack.c.h.bf16 %v2836_v22  ;;  %v2835_v41 = vld [vmem:[%s4149_s7 + $0x218] sm:$0xff]  }
 0x1e0   :  { %838 = vmatpush.msra.mxu2 %v2206_v49 }
 0x1e1   :  { %948 = vmatpush.msra.mxu3 %v2303_v32  ;;  %v372_v32 = vsel %vm3534_vm4, %v3234_v38, %v3473_v56  ;;  %v2839_v38 = vld [vmem:[%s4149_s7 + $0x238] sm:$0xff]  }
 0x1e3   :  { %949 = vmatpush.msra.mxu3 %v2302_v39  ;;  %v371_v39 = vsel %vm3553_vm8, %v3226_v36, %v3473_v56 }
 0x1e5   :  { %950 = vmatpush.msra.mxu3 %v2299_v47 }
 0x1e7   :  { %951 = vmatpush.msra.mxu3 %v2298_v19 }
 0x1ee   :  { %v3453_v33 = vpop.permute.xlu2 %390 }
 0x1f6   :  { %v3495_v63 = vpop.permute.xlu2 %442 }
 0x1fe   :  { %v393_v8 = vpop.permute.xlu2 %392 }
 0x1ff   :  { %v401_v13 = vsel %vm163_vm9, %v3453_v33, %v393_v8 }
 0x200   :  { %v424_v26 = vsel %vm3525_vm12, %v401_v13, %v3473_v56 }
 0x201   :  { %v430_v34 = vmax.f32 %v372_v32, %v424_v26  ;;  %v2435_v26 = vunpack.c.h.bf16 %v2844_v6 }
 0x206   :  { %v3467_v50 = vpop.permute.xlu1 %495  ;;  %v435_v37 = vpop.permute.xlu2 %434 }
 0x20e   :  { %v3665_v31 = vpop.permute.xlu2 %448 }
 0x212   :  { %v379_v2 = vpop.permute.xlu0 %378  ;;  %v445_v3 = vpop.permute.xlu1 %444 }
 0x213   :  { %v453_v21 = vsel %vm4154_vm14, %v3495_v63, %v445_v3  ;;  %v2406_v3 = vunpack.c.l.bf16 %v3598_v55  ;;  %v2875_v55 = vld [vmem:[%s4149_s7 + $0x368] sm:$0xff]  }
 0x214   :  { %v477_v18 = vsel %vm3538_vm10, %v453_v21, %v3473_v56  ;;  %v2402_v21 = vunpack.c.l.bf16 %v2836_v22 }
 0x215   :  { %v483_v42 = vmax.f32 %v430_v34, %v477_v18  ;;  %v2399_v18 = vunpack.c.h.bf16 %v2835_v41  ;;  %v2434_v34 = vunpack.c.l.bf16 %v2844_v6  ;;  %v2854_v6 = vld [vmem:[%s4149_s7 + $0x2b8] sm:$0xff]  }
 0x21a   :  { %v3531_v14 = vpop.permute.xlu0 %493  ;;  %v389_v16 = vpop.permute.xlu1 %388 }
 0x21b   :  { %v400_v1 = vsel %vm163_vm9, %v389_v16, %v3453_v33  ;;  %v505_v44 = vsel %vm230_vm1, %v3531_v14, %v3467_v50  ;;  %v410_v48 = vsel %vm163_vm9, %v379_v2, %v389_v16 }
 0x21c   :  { %v423_v33 = vsel %vm3544_vm13, %v400_v1, %v3473_v56  ;;  %v527_v49 = vsel %vm3579_vm0, %v505_v44, %v3473_v56  ;;  %v422_v2 = vsel %vm3586_vm3, %v410_v48, %v3473_v56  ;;  %v2856_v1 = vld [vmem:[%s4149_s7 + $0x2c8] sm:$0xff]   ;;  %v2431_v44 = vunpack.c.h.bf16 %v2843_v35 }
 0x21d   :  { %v429_v51 = vmax.f32 %v371_v39, %v423_v33  ;;  %v428_v11 = vmax.f32 %v370_v7, %v422_v2  ;;  %v2483_v33 = vunpack.c.h.bf16 %v2856_v1  ;;  %v2833_v2 = vld [vmem:[%s4149_s7 + $0x208] sm:$0xff]  }
 0x222   :  { %v498_v36 = vpop.permute.xlu0 %497  ;;  %v441_v47 = vpop.permute.xlu1 %440 }
 0x223   :  { %v506_v53 = vsel %vm230_vm1, %v3467_v50, %v498_v36  ;;  %v452_v19 = vsel %vm4154_vm14, %v441_v47, %v3495_v63  ;;  %v462_v61 = vsel %vm4154_vm14, %v435_v37, %v441_v47  ;;  %v520_v63 = vperm.slane %v519_v17, 0  ;;  %v2829_v37 = vld [vmem:[%s4149_s7 + $0x1e0] sm:$0xff]  }
 0x224   :  { %v528_v58 = vsel %vm3571_vm7, %v506_v53, %v3473_v56  ;;  %v476_v50 = vsel %vm3575_vm15, %v452_v19, %v3473_v56  ;;  %v475_v8 = vsel %vm3607_vm2, %v462_v61, %v3473_v56  ;;  %v2855_v36 = vld [vmem:[%s4149_s7 + $0x2c0] sm:$0xff]   ;;  %v2482_v47 = vunpack.c.l.bf16 %v2856_v1  ;;  %v2842_v53 = vld [vmem:[%s4149_s7 + $0x250] sm:$0xff]  }
 0x225   :  { %v3614_v60 = vmax.f32 %v483_v42, %v528_v58  ;;  %v482_v62 = vmax.f32 %v429_v51, %v476_v50  ;;  %vm3647_vm14 = vcmp.eq.s32.totalorder %v520_v63, 1  ;;  %v481_v27 = vmax.f32 %v428_v11, %v475_v8  ;;  %v2828_v63 = vld [vmem:[%s4149_s7 + $0x1d8] sm:$0xff]  }
 0x226   :  { %v2398_v42 = vunpack.c.l.bf16 %v2835_v41  ;;  %v2375_v48 = vunpack.c.h.bf16 %v2829_v37  ;;  %v2430_v61 = vunpack.c.l.bf16 %v2843_v35  ;;  %v2374_v22 = vunpack.c.l.bf16 %v2829_v37 }
 0x227   :  { %v3632_v4 = vmax.f32 %v482_v62, %v527_v49  ;;  %v708_v5 = vrot.slane %v3614_v60, 2  ;;  %v2479_v62 = vunpack.c.h.bf16 %v2855_v36  ;;  %v2371_v8 = vunpack.c.h.bf16 %v2828_v63 }
 0x228   :  { %v2426_v11 = vunpack.c.l.bf16 %v2842_v53  ;;  %v2370_v1 = vunpack.c.l.bf16 %v2828_v63 }
 0x229   :  { %1878 = vmatmul.msk.f32.vlgmr.msra.gmra.mxu0 %vm711_vm6, %v708_v5  ;;  %v707_v15 = vrot.slane %v3632_v4, 2  ;;  %v2478_v5 = vunpack.c.l.bf16 %v2855_v36  ;;  %v927_v41 = vrot.slane %v3632_v4, 4 }
 0x22a   :  { %1090 = vmatpush.msra.mxu0 %v2406_v3  ;;  %v3655_v16 = vpop.permute.xlu0 %396  ;;  %v488_v17 = vpop.permute.xlu1 %487  ;;  %v2427_v3 = vunpack.c.h.bf16 %v2842_v53 }
 0x22b   :  { %v515_v28 = vsel %vm230_vm1, %v488_v17, %v3531_v14  ;;  %754 = vmatmul.f32.vlgmr.msrb.gmra.mxu3 %v707_v15  ;;  %v2841_v15 = vld [vmem:[%s4149_s7 + $0x248] sm:$0xff]   ;;  %v2475_v17 = vunpack.c.h.bf16 %v2854_v6 }
 0x22c   :  { %v526_v32 = vsel %vm3647_vm14, %v515_v28, %v3473_v56  ;;  %1091 = vmatpush.msra.mxu0 %v2403_v9  ;;  %1110 = vmatpush.msrb.mxu3 %v2438_v10  ;;  %v2834_v56 = vld [vmem:[%s4149_s7 + $0x210] sm:$0xff]   ;;  %v3708_v9 = vpop.permute.xlu2 %380  ;;  %v2391_v10 = vunpack.c.h.bf16 %v2833_v2 }
 0x22d   :  { %v3673_v14 = vmax.f32 %v481_v27, %v526_v32  ;;  %v2395_v51 = vunpack.c.h.bf16 %v2834_v56  ;;  %v2394_v49 = vunpack.c.l.bf16 %v2834_v56  ;;  %v2390_v27 = vunpack.c.l.bf16 %v2833_v2  ;;  %v2853_v32 = vld [vmem:[%s4149_s7 + $0x2b0] sm:$0xff]  }
 0x22e   :  { %1092 = vmatpush.msra.mxu0 %v2402_v21  ;;  %1111 = vmatpush.msrb.mxu3 %v2435_v26  ;;  %v2827_v21 = vld [vmem:[%s4149_s7 + $0x1d0] sm:$0xff]   ;;  %v2832_v26 = vld [vmem:[%s4149_s7 + $0x200] sm:$0xff]   ;;  %v2422_v56 = vunpack.c.l.bf16 %v2841_v15 }
 0x22f   :  { %799 = vmatmul.f32.vlgmr.msra.gmra.mxu1 %v3673_v14  ;;  %v706_v39 = vrot.slane %v3673_v14, 2  ;;  %v926_v50 = vrot.slane %v3673_v14, 4  ;;  %v2367_v30 = vunpack.c.h.bf16 %v2827_v21  ;;  %v2830_v2 = vld [vmem:[%s4149_s7 + $0x1f0] sm:$0xff]  }
 0x230   :  { %1093 = vmatpush.msra.mxu0 %v2399_v18  ;;  %1112 = vmatpush.msrb.mxu3 %v2434_v34  ;;  %v2423_v18 = vunpack.c.h.bf16 %v2841_v15  ;;  %v2474_v34 = vunpack.c.l.bf16 %v2854_v6 }
 0x231   :  { %1240 = vmatpush.msra.mxu1 %v2483_v33  ;;  %734 = vmatmul.f32.vlgmr.msrb.gmra.mxu2 %v706_v39  ;;  %v2471_v39 = vunpack.c.h.bf16 %v2853_v32 }
 0x232   :  { %819 = vmatmul.f32.vlgmr.msrb.gmra.mxu0 %v3632_v4  ;;  %1922 = vmatpush.msk.msrb.mxu2 %vm714_vm5, %v925_v25  ;;  %v3691_v19 = vpop.permute.xlu0 %394  ;;  %v3693_v58 = vpop.permute.xlu1 %367 }
 0x233   :  { %1094 = vmatpush.msra.mxu0 %v2398_v42  ;;  %1113 = vmatpush.msrb.mxu3 %v2431_v44  ;;  %v402_v7 = vsel %vm163_vm9, %v3691_v19, %v3655_v16  ;;  %v374_v28 = vsel %vm3553_vm8, %v3254_v45, %v3693_v58  ;;  %v2387_v45 = vunpack.c.h.bf16 %v2832_v26  ;;  %v2826_v42 = vld [vmem:[%s4149_s7 + $0x1c8] sm:$0xff]   ;;  %v2831_v44 = vld [vmem:[%s4149_s7 + $0x1f8] sm:$0xff]   ;;  %v375_v12 = vsel %vm3534_vm4, %v3268_v52, %v3693_v58  ;;  %v2872_v52 = vld [vmem:[%s4149_s7 + $0x350] sm:$0xff]  }
 0x234   :  { %1241 = vmatpush.msra.mxu1 %v2482_v47  ;;  %952 = vmatmul.f32.vlgmr.msra.gmra.mxu3 %v926_v50  ;;  %v426_v29 = vsel %vm3544_vm13, %v402_v7, %v3693_v58  ;;  %vm4191_vm13 = vcmask 146432   ;;  %v2366_v47 = vunpack.c.l.bf16 %v2827_v21  ;;  %v2419_v50 = vunpack.c.h.bf16 %v2840_v24  ;;  %v1964_v7 = vld [vmem:[%s4149_s7 + $0x28c] sm:$0x3]  ;;  %v2838_v21 = vld [vmem:[%s4149_s7 + $0x230] sm:$0xff]  }
 0x235   :  { %984 = vmatpush.msrb.mxu2 %v2375_v48  ;;  %1095 = vmatpush.msra.mxu0 %v2395_v51  ;;  %v432_v25 = vmax.f32 %v374_v28, %v426_v29  ;;  %v2386_v48 = vunpack.c.l.bf16 %v2832_v26  ;;  %v2852_v51 = vld [vmem:[%s4149_s7 + $0x2a8] sm:$0xff]   ;;  %v2383_v63 = vunpack.c.h.bf16 %v2831_v44  ;;  %v2382_v6 = vunpack.c.l.bf16 %v2831_v44  ;;  %vm4192_vm8 = vmmov %vm4191_vm13 }
 0x236   :  { %1114 = vmatpush.msrb.mxu3 %v2430_v61  ;;  %1242 = vmatpush.msra.mxu1 %v2479_v62  ;;  %v2470_v61 = vunpack.c.l.bf16 %v2853_v32  ;;  %v2363_v62 = vunpack.c.h.bf16 %v2826_v42  ;;  %v1079_v26 = vunpack.c.l.bf16 %v1964_v7  ;;  %v928_v28 = vrot.slane %v3614_v60, 4 }
 0x237   :  { %985 = vmatpush.msrb.mxu2 %v2374_v22  ;;  %1096 = vmatpush.msra.mxu0 %v2394_v49  ;;  %v2418_v22 = vunpack.c.l.bf16 %v2840_v24  ;;  %v2467_v49 = vunpack.c.h.bf16 %v2852_v51  ;;  %v2378_v32 = vunpack.c.l.bf16 %v2830_v2  ;;  %v411_v24 = vsel %vm163_vm9, %v3708_v9, %v3691_v19  ;;  %v2868_v9 = vld [vmem:[%s4149_s7 + $0x328] sm:$0xff]  }
 0x238   :  { %1115 = vmatpush.msrb.mxu3 %v2427_v3  ;;  %1243 = vmatpush.msra.mxu1 %v2478_v5  ;;  %v437_v3 = vpop.permute.xlu2 %436  ;;  %v2362_v5 = vunpack.c.l.bf16 %v2826_v42  ;;  %v2410_v42 = vunpack.c.l.bf16 %v2838_v21  ;;  %v1081_v7 = vrot.slane %v3632_v4, 6 }
 0x239   :  { %972 = vmatmul.f32.vlgmr.msrb.gmra.mxu1 %v927_v41  ;;  %986 = vmatpush.msrb.mxu2 %v2371_v8  ;;  %v2415_v8 = vunpack.c.h.bf16 %v2839_v38  ;;  %v2379_v41 = vunpack.c.h.bf16 %v2830_v2 }
 0x23a   :  { %1097 = vmatpush.msra.mxu0 %v2391_v10  ;;  %1116 = vmatpush.msrb.mxu3 %v2426_v11  ;;  %v3730_v35 = vpop.permute.xlu0 %446  ;;  %v3732_v33 = vpop.permute.xlu1 %489  ;;  %v2466_v10 = vunpack.c.l.bf16 %v2852_v51  ;;  %v2851_v11 = vld [vmem:[%s4149_s7 + $0x2a0] sm:$0xff]   ;;  %v2847_v51 = vld [vmem:[%s4149_s7 + $0x278] sm:$0xff]  }
 0x23b   :  { %1244 = vmatpush.msra.mxu1 %v2475_v17  ;;  %1880 = vmatmul.msk.f32.vlgmr.msra.gmra.mxu2 %vm711_vm6, %v3614_v60  ;;  %v454_v37 = vsel %vm4191_vm13, %v3730_v35, %v3665_v31  ;;  %v1963_v17 = vld [vmem:[%s4149_s7 + $0x288] sm:$0xf]  ;;  %v2463_v29 = vunpack.c.h.bf16 %v2851_v11  ;;  %v463_v44 = vsel %vm4192_vm8, %v437_v3, %v3730_v35  ;;  %v2447_v3 = vunpack.c.h.bf16 %v2847_v51 }
 0x23c   :  { %987 = vmatpush.msrb.mxu2 %v2370_v1  ;;  %1098 = vmatpush.msra.mxu0 %v2390_v27  ;;  %v479_v36 = vsel %vm3575_vm15, %v454_v37, %v3693_v58  ;;  %v2414_v1 = vunpack.c.l.bf16 %v2839_v38  ;;  %v1924_v27 = vld [vmem:[%s4149_s7 + $0x1ec] sm:$0xf]  ;;  %v478_v38 = vsel %vm3607_vm2, %v463_v44, %v3693_v58 }
 0x23d   :  { %1117 = vmatpush.msrb.mxu3 %v2423_v18  ;;  %1245 = vmatpush.msra.mxu1 %v2474_v34  ;;  %v3754_v53 = vmax.f32 %v432_v25, %v479_v36  ;;  %v2848_v18 = vld [vmem:[%s4149_s7 + $0x280] sm:$0xff]   ;;  %v1078_v34 = vunpack.c.l.bf16 %v1963_v17  ;;  %v2462_v25 = vunpack.c.l.bf16 %v2851_v11  ;;  %v1039_v37 = vunpack.c.l.bf16 %v1924_v27  ;;  %v2883_v27 = vld [vmem:[%s4149_s7 + $0x3a8] sm:$0xff]  }
 0x23e   :  { %988 = vmatpush.msrb.mxu2 %v2367_v30  ;;  %1099 = vmatpush.msra.mxu0 %v2387_v45  ;;  %v2411_v30 = vunpack.c.h.bf16 %v2838_v21  ;;  %v2850_v45 = vld [vmem:[%s4149_s7 + $0x298] sm:$0xff]   ;;  %v373_v36 = vsel %vm3600_vm11, %v3273_v54, %v3693_v58  ;;  %v1080_v54 = vrot.slane %v3673_v14, 6  ;;  %v2446_v17 = vunpack.c.l.bf16 %v2847_v51 }
 0x23f   :  { %1118 = vmatpush.msrb.mxu3 %v2422_v56  ;;  %1246 = vmatpush.msra.mxu1 %v2471_v39  ;;  %v2007_v56 = vld [vmem:[%s4149_s7 + $0x330] sm:$0x3]  ;;  %v2451_v39 = vunpack.c.h.bf16 %v2848_v18  ;;  %v2459_v19 = vunpack.c.h.bf16 %v2850_v45  ;;  %v2458_v57 = vunpack.c.l.bf16 %v2850_v45  ;;  %v2559_v21 = vunpack.c.h.bf16 %v2875_v55 }
 0x240   :  { %989 = vmatpush.msrb.mxu2 %v2366_v47  ;;  %1100 = vmatpush.msra.mxu0 %v2386_v48  ;;  %v425_v47 = vsel %vm3586_vm3, %v411_v24, %v3693_v58  ;;  %v2450_v48 = vunpack.c.l.bf16 %v2848_v18  ;;  %v1233_v35 = vunpack.c.l.bf16 %v2007_v56  ;;  %v2866_v18 = vld [vmem:[%s4149_s7 + $0x318] sm:$0xff]   ;;  %v2442_v45 = vunpack.c.l.bf16 %v2846_v43 }
 0x241   :  { %1119 = vmatpush.msrb.mxu3 %v2419_v50  ;;  %1247 = vmatpush.msra.mxu1 %v2470_v61  ;;  %v3812_v50 = vld [vmem:[%s4149_s7 + $0x370] sm:$0xff]   ;;  %v500_v61 = vpop.permute.xlu2 %499  ;;  %v431_v14 = vmax.f32 %v373_v36, %v425_v47  ;;  %v2523_v56 = vunpack.c.h.bf16 %v2866_v18  ;;  %v1082_v36 = vrot.slane %v3614_v60, 6  ;;  %v2522_v47 = vunpack.c.l.bf16 %v2866_v18 }
 0x242   :  { %990 = vmatpush.msrb.mxu2 %v2363_v62  ;;  %1101 = vmatpush.msra.mxu0 %v2383_v63  ;;  %v3768_v15 = vpop.permute.xlu1 %398  ;;  %v2849_v63 = vld [vmem:[%s4149_s7 + $0x290] sm:$0xff]   ;;  %v2562_v59 = vunpack.c.l.bf16 %v3812_v50 }
 0x243   :  { %1120 = vmatpush.msrb.mxu3 %v2418_v22  ;;  %1248 = vmatpush.msra.mxu1 %v2467_v49  ;;  %v2531_v22 = vunpack.c.h.bf16 %v2868_v9  ;;  %v484_v11 = vmax.f32 %v431_v14, %v478_v38  ;;  %v2454_v4 = vunpack.c.l.bf16 %v2849_v63 }
 0x244   :  { %991 = vmatpush.msrb.mxu2 %v2362_v5  ;;  %1102 = vmatpush.msra.mxu0 %v2382_v6  ;;  %v2867_v5 = vld [vmem:[%s4149_s7 + $0x320] sm:$0xff]  }
 0x245   :  { %1121 = vmatpush.msrb.mxu3 %v2415_v8  ;;  %1249 = vmatpush.msra.mxu1 %v2466_v10  ;;  %v2455_v8 = vunpack.c.h.bf16 %v2849_v63  ;;  %v2530_v10 = vunpack.c.l.bf16 %v2868_v9  ;;  %v2526_v13 = vunpack.c.l.bf16 %v2867_v5  ;;  %v2865_v9 = vld [vmem:[%s4149_s7 + $0x310] sm:$0xff]  }
 0x246   :  { %1923 = vmatmul.msk.f32.vlgmr.msrb.gmra.mxu2 %vm711_vm6, %v928_v28  ;;  %1103 = vmatpush.msra.mxu0 %v2379_v41  ;;  %v516_v41 = vsel %vm230_vm1, %v3732_v33, %v500_v61  ;;  %v2874_v33 = vld [vmem:[%s4149_s7 + $0x360] sm:$0xff]   ;;  %v2519_v60 = vunpack.c.h.bf16 %v2865_v9 }
 0x247   :  { %1965 = vmatpush.msk.msra.mxu2 %vm714_vm5, %v1079_v26  ;;  %1122 = vmatpush.msrb.mxu3 %v2414_v1  ;;  %v2527_v26 = vunpack.c.h.bf16 %v2867_v5  ;;  %v2443_v1 = vunpack.c.h.bf16 %v2846_v43  ;;  %v529_v28 = vsel %vm3647_vm14, %v516_v41, %v3693_v58  ;;  %v2555_v24 = vunpack.c.h.bf16 %v2874_v33 }
 0x248   :  { %1250 = vmatpush.msra.mxu1 %v2463_v29  ;;  %1104 = vmatpush.msra.mxu0 %v2378_v32  ;;  %v2558_v29 = vunpack.c.l.bf16 %v2875_v55  ;;  %vm1782_vm14 = vcmask 261120  }
 0x249   :  { %1138 = vmatpush.msra.mxu2 %v1078_v34  ;;  %1123 = vmatpush.msrb.mxu3 %v2411_v30  ;;  %v3864_v34 = vmax.f32 %v484_v11, %v529_v28  ;;  %v403_v30 = vsel %vm163_vm9, %v3655_v16, %v3768_v15  ;;  %v2873_v16 = vld [vmem:[%s4149_s7 + $0x358] sm:$0xff]   ;;  %v2882_v15 = vld [vmem:[%s4149_s7 + $0x3a0] sm:$0xff]   ;;  %vm4193_vm9 = vmmov %vm4192_vm8  ;;  %v2546_v11 = vunpack.c.l.bf16 %v2872_v52 }
 0x24a   :  { %1251 = vmatpush.msra.mxu1 %v2462_v25  ;;  %1105 = vmatpush.msra.mxu0 %v1039_v37  ;;  %v3816_v62 = vpop.permute.xlu1 %501  ;;  %v2591_v25 = vunpack.c.h.bf16 %v2883_v27  ;;  %v2439_v37 = vunpack.c.h.bf16 %v3623_v0  ;;  %v427_v44 = vsel %vm3525_vm12, %v403_v30, %v3693_v58  ;;  %v2554_v0 = vunpack.c.l.bf16 %v2874_v33  ;;  %v2861_v33 = vld [vmem:[%s4149_s7 + $0x2f0] sm:$0xff]  }
 0x24b   :  { %1139 = vmatpush.msra.mxu2 %v2451_v39  ;;  %1124 = vmatpush.msrb.mxu3 %v2410_v42  ;;  %v507_v49 = vsel %vm230_vm1, %v500_v61, %v3816_v62  ;;  %v2864_v39 = vld [vmem:[%s4149_s7 + $0x308] sm:$0xff]   ;;  %v451_v42 = vpop.permute.xlu0 %450  ;;  %v2551_v51 = vunpack.c.h.bf16 %v2873_v16  ;;  %v2587_v61 = vunpack.c.h.bf16 %v2882_v15  ;;  %v2550_v38 = vunpack.c.l.bf16 %v2873_v16 }
 0x24c   :  { %1252 = vmatpush.msra.mxu1 %v2459_v19  ;;  %1106 = vmatmul.f32.vlgmr.msra.gmra.mxu0 %v1080_v54  ;;  %v530_v2 = vsel %vm3579_vm0, %v507_v49, %v3693_v58  ;;  %v2590_v19 = vunpack.c.l.bf16 %v2883_v27  ;;  %v455_v54 = vsel %vm4193_vm9, %v3665_v31, %v451_v42  ;;  %v2514_v63 = vunpack.c.l.bf16 %v2864_v39  ;;  %v2881_v31 = vld [vmem:[%s4149_s7 + $0x398] sm:$0xff]   ;;  %v2050_v49 = vld [vmem:[%s4149_s7 + $0x3d4] sm:$0x3]  ;;  %v2878_v42 = vld [vmem:[%s4149_s7 + $0x380] sm:$0xff]  }
 0x24d   :  { %1140 = vmatpush.msra.mxu2 %v2450_v48  ;;  %2008 = vmatpush.msk.msrb.mxu0 %vm714_vm5, %v1233_v35  ;;  %v3838_v6 = vmax.f32 %v3754_v53, %v530_v2  ;;  %v3849_v53 = vld [vmem:[%s4149_s7 + $0x3b0] sm:$0xff]   ;;  %v504_v48 = vpop.permute.xlu2 %503  ;;  %v2515_v35 = vunpack.c.h.bf16 %v2864_v39  ;;  %v480_v55 = vsel %vm3538_vm10, %v455_v54, %v3693_v58  ;;  %v2511_v2 = vunpack.c.h.bf16 %v2863_v20  ;;  %v2877_v54 = vld [vmem:[%s4149_s7 + $0x378] sm:$0xff]  }
 0x24e   :  { %1125 = vmatpush.msrb.mxu3 %v2407_v46  ;;  %1253 = vmatpush.msra.mxu1 %v2458_v57  ;;  %v2594_v32 = vunpack.c.l.bf16 %v3849_v53  ;;  %v433_v46 = vmax.f32 %v375_v12, %v427_v44  ;;  %v508_v57 = vsel %vm230_vm1, %v3816_v62, %v504_v48  ;;  %v2586_v62 = vunpack.c.l.bf16 %v2882_v15  ;;  %v2869_v15 = vld [vmem:[%s4149_s7 + $0x338] sm:$0xff]   ;;  %v2859_v12 = vld [vmem:[%s4149_s7 + $0x2e0] sm:$0xff]  }
 0x24f   :  { %1288 = vmatpush.msrb.mxu0 %v2531_v22  ;;  %1126 = vmatmul.f32.vlgmr.msrb.gmra.mxu3 %v1081_v7  ;;  %v2518_v22 = vunpack.c.l.bf16 %v2865_v9  ;;  %v531_v14 = vsel %vm3571_vm7, %v508_v57, %v3693_v58  ;;  %v2583_v5 = vunpack.c.h.bf16 %v2881_v31  ;;  %v2862_v7 = vld [vmem:[%s4149_s7 + $0x2f8] sm:$0xff]   ;;  %v1383_v58 = vunpack.c.l.bf16 %v2050_v49 }
 0x250   :  { %1141 = vmatpush.msra.mxu2 %v2447_v3  ;;  %1396 = vmatpush.msra.mxu3 %v2562_v59  ;;  %v2547_v3 = vunpack.c.h.bf16 %v2872_v52  ;;  %v486_v59 = vmax.f32 %v433_v46, %v480_v55  ;;  %v2582_v41 = vunpack.c.l.bf16 %v2881_v31  ;;  %v2506_v27 = vunpack.c.l.bf16 %v2862_v7  ;;  %v2093_v52 = vld [vmem:[%s4149_s7 + $0x478] sm:$0x3] }
 0x251   :  { %1254 = vmatpush.msra.mxu1 %v2455_v8  ;;  %1289 = vmatpush.msrb.mxu0 %v2530_v10  ;;  %v2871_v8 = vld [vmem:[%s4149_s7 + $0x348] sm:$0xff]   ;;  %v2880_v10 = vld [vmem:[%s4149_s7 + $0x390] sm:$0xff]   ;;  %v2502_v39 = vunpack.c.l.bf16 %v2861_v33  ;;  %v2571_v48 = vunpack.c.h.bf16 %v2878_v42  ;;  %v2534_v46 = vunpack.c.l.bf16 %v2869_v15  ;;  %v2570_v57 = vunpack.c.l.bf16 %v2878_v42 }
 0x252   :  { %1142 = vmatpush.msra.mxu2 %v2446_v17  ;;  %1397 = vmatpush.msra.mxu3 %v2559_v21  ;;  %v3926_v43 = vmax.f32 %v486_v59, %v531_v14  ;;  %v2887_v17 = vld [vmem:[%s4149_s7 + $0x3c8] sm:$0xff]   ;;  %v2507_v21 = vunpack.c.h.bf16 %v2862_v7  ;;  %v2542_v18 = vunpack.c.l.bf16 %v2871_v8  ;;  %v2578_v30 = vunpack.c.l.bf16 %v2880_v10  ;;  %v2907_v14 = vld [vmem:[%s4149_s7 + $0x470] sm:$0xff]  }
 0x253   :  { %1255 = vmatpush.msra.mxu1 %v2454_v4  ;;  %1290 = vmatpush.msrb.mxu0 %v2527_v26  ;;  %v1382_v4 = vunpack.c.l.bf16 %v2049_v23  ;;  %v2543_v26 = vunpack.c.h.bf16 %v2871_v8  ;;  %v2607_v28 = vunpack.c.h.bf16 %v2887_v17  ;;  %v2494_v31 = vunpack.c.l.bf16 %v2859_v12 }
 0x254   :  { %1143 = vmatpush.msra.mxu2 %v2443_v1  ;;  %1256 = vmatmul.f32.vlgmr.msra.gmra.mxu1 %v3864_v34  ;;  %v2579_v1 = vunpack.c.h.bf16 %v2880_v10  ;;  %v2595_v49 = vunpack.c.h.bf16 %v3849_v53  ;;  %v1539_v55 = vunpack.c.l.bf16 %v2093_v52  ;;  %v1388_v7 = vrot.slane %v3926_v43, 2  ;;  %v4041_v52 = vld [vmem:[%s4149_s7 + $0x4f8] sm:$0xff]  }
 0x255   :  { %1398 = vmatpush.msra.mxu3 %v2558_v29  ;;  %1416 = vmatpush.msrb.mxu1 %v2594_v32  ;;  %v2870_v29 = vld [vmem:[%s4149_s7 + $0x340] sm:$0xff]   ;;  %v2879_v32 = vld [vmem:[%s4149_s7 + $0x388] sm:$0xff]   ;;  %v2687_v23 = vunpack.c.h.bf16 %v2907_v14  ;;  %v2563_v53 = vunpack.c.h.bf16 %v3812_v50  ;;  %vm1806_vm1 = vcmask 50176  }
 0x256   :  { %1144 = vmatpush.msra.mxu2 %v2442_v45  ;;  %1291 = vmatpush.msrb.mxu0 %v2526_v13  ;;  %v2886_v45 = vld [vmem:[%s4149_s7 + $0x3c0] sm:$0xff]   ;;  %v2503_v13 = vunpack.c.h.bf16 %v2861_v33  ;;  %v2538_v44 = vunpack.c.l.bf16 %v2870_v29  ;;  %v2906_v50 = vld [vmem:[%s4149_s7 + $0x468] sm:$0xff]  }
 0x257   :  { %1399 = vmatpush.msra.mxu3 %v2555_v24  ;;  %1417 = vmatpush.msrb.mxu1 %v2591_v25  ;;  %v2606_v24 = vunpack.c.l.bf16 %v2887_v17  ;;  %v2539_v25 = vunpack.c.h.bf16 %v2870_v29  ;;  %v2603_v16 = vunpack.c.h.bf16 %v2886_v45  ;;  %v2914_v17 = vld [vmem:[%s4149_s7 + $0x4b0] sm:$0xff]   ;;  %v2683_v33 = vunpack.c.h.bf16 %v2906_v50 }
 0x258   :  { %1145 = vmatpush.msra.mxu2 %v2439_v37  ;;  %1292 = vmatpush.msrb.mxu0 %v2523_v56  ;;  %v2575_v37 = vunpack.c.h.bf16 %v2879_v32  ;;  %v2860_v56 = vld [vmem:[%s4149_s7 + $0x2e8] sm:$0xff]   ;;  %v2895_v29 = vld [vmem:[%s4149_s7 + $0x410] sm:$0xff]  }
 0x259   :  { %1400 = vmatpush.msra.mxu3 %v2554_v0  ;;  %1418 = vmatpush.msrb.mxu1 %v2590_v19  ;;  %v2574_v0 = vunpack.c.l.bf16 %v2879_v32  ;;  %v2885_v19 = vld [vmem:[%s4149_s7 + $0x3b8] sm:$0xff]   ;;  %v2499_v9 = vunpack.c.h.bf16 %v2860_v56  ;;  %v2901_v32 = vld [vmem:[%s4149_s7 + $0x440] sm:$0xff]   ;;  %v2638_v42 = vunpack.c.l.bf16 %v2895_v29 }
 0x25a   :  { %1966 = vmatmul.msk.f32.vlgmr.msra.gmra.mxu2 %vm711_vm6, %v1082_v36  ;;  %1293 = vmatpush.msrb.mxu0 %v2522_v47  ;;  %v2602_v36 = vunpack.c.l.bf16 %v2886_v45  ;;  %v2535_v47 = vunpack.c.h.bf16 %v2869_v15  ;;  %v2598_v20 = vunpack.c.l.bf16 %v2885_v19  ;;  %v2905_v45 = vld [vmem:[%s4149_s7 + $0x460] sm:$0xff]   ;;  %v2900_v15 = vld [vmem:[%s4149_s7 + $0x438] sm:$0xff]  }
 0x25b   :  { %1260 = vmatpush.msrb.mxu2 %v2515_v35  ;;  %1401 = vmatpush.msra.mxu3 %v2551_v51  ;;  %v2498_v35 = vunpack.c.l.bf16 %v2860_v56  ;;  %v2599_v51 = vunpack.c.h.bf16 %v2885_v19  ;;  %v2679_v56 = vunpack.c.h.bf16 %v2905_v45  ;;  %v2912_v19 = vld [vmem:[%s4149_s7 + $0x4a0] sm:$0xff]  }
 0x25c   :  { %1419 = vmatpush.msrb.mxu1 %v2587_v61  ;;  %1294 = vmatpush.msrb.mxu0 %v2519_v60  ;;  %v2010_v61 = vld [vmem:[%s4149_s7 + $0x334] sm:$0xf]  ;;  %v2495_v60 = vunpack.c.h.bf16 %v2859_v12 }
 0x25d   :  { %1261 = vmatpush.msrb.mxu2 %v2514_v63  ;;  %1402 = vmatpush.msra.mxu3 %v2550_v38  ;;  %v1343_v63 = vunpack.c.l.bf16 %v2010_v61  ;;  %v2567_v38 = vunpack.c.h.bf16 %v2877_v54  ;;  %v2899_v61 = vld [vmem:[%s4149_s7 + $0x430] sm:$0xff]  }
 0x25e   :  { %1420 = vmatpush.msrb.mxu1 %v2586_v62  ;;  %1295 = vmatpush.msrb.mxu0 %v2518_v22  ;;  %v2903_v62 = vld [vmem:[%s4149_s7 + $0x450] sm:$0xff]   ;;  %v2858_v22 = vld [vmem:[%s4149_s7 + $0x2d8] sm:$0xff]  }
 0x25f   :  { %1262 = vmatpush.msrb.mxu2 %v2511_v2  ;;  %1403 = vmatpush.msra.mxu3 %v2547_v3  ;;  %v1386_v2 = vrot.slane %v3864_v34, 2  ;;  %v2566_v3 = vunpack.c.l.bf16 %v2877_v54  ;;  %v2671_v59 = vunpack.c.h.bf16 %v2903_v62  ;;  %v2670_v8 = vunpack.c.l.bf16 %v2903_v62  ;;  %v2922_v62 = vld [vmem:[%s4149_s7 + $0x4f0] sm:$0xff]  }
 0x260   :  { %1421 = vmatpush.msrb.mxu1 %v2583_v5  ;;  %2009 = vmatmul.msk.f32.vlgmr.msrb.gmra.mxu0 %vm711_vm6, %v3926_v43  ;;  %v2491_v5 = vunpack.c.h.bf16 %v2858_v22  ;;  %v2490_v10 = vunpack.c.l.bf16 %v2858_v22  ;;  %v2892_v22 = vld [vmem:[%s4149_s7 + $0x3f8] sm:$0xff]  }
 0x261   :  { %1263 = vmatpush.msrb.mxu2 %v2510_v40  ;;  %2051 = vmatpush.msk.msra.mxu0 %vm714_vm5, %v1383_v58  ;;  %v3986_v40 = vld [vmem:[%s4149_s7 + $0x4b8] sm:$0xff]   ;;  %v2902_v58 = vld [vmem:[%s4149_s7 + $0x448] sm:$0xff]  }
 0x262   :  { %1404 = vmatpush.msra.mxu3 %v2546_v11  ;;  %1422 = vmatpush.msrb.mxu1 %v2582_v41  ;;  %v2857_v11 = vld [vmem:[%s4149_s7 + $0x2d0] sm:$0xff]   ;;  %v2686_v41 = vunpack.c.l.bf16 %v2907_v14  ;;  %v2898_v14 = vld [vmem:[%s4149_s7 + $0x428] sm:$0xff]  }
 0x263   :  { %1264 = vmatpush.msrb.mxu2 %v2507_v21  ;;  %1444 = vmatpush.msra.mxu0 %v1382_v4  ;;  %v2718_v21 = vunpack.c.l.bf16 %v3986_v40  ;;  %v2667_v4 = vunpack.c.h.bf16 %v2902_v58 }
 0x264   :  { %1405 = vmatpush.msra.mxu3 %v2543_v26  ;;  %1423 = vmatpush.msrb.mxu1 %v2579_v1  ;;  %v1387_v26 = vrot.slane %v3838_v6, 2  ;;  %v2487_v1 = vunpack.c.h.bf16 %v2857_v11 }
 0x265   :  { %1265 = vmatpush.msrb.mxu2 %v2506_v27  ;;  %1445 = vmatpush.msra.mxu0 %v2607_v28  ;;  %v2715_v27 = vunpack.c.h.bf16 %v2914_v17  ;;  %v2666_v28 = vunpack.c.l.bf16 %v2902_v58 }
 0x266   :  { %1406 = vmatpush.msra.mxu3 %v2542_v18  ;;  %1424 = vmatpush.msrb.mxu1 %v2578_v30  ;;  %v2486_v18 = vunpack.c.l.bf16 %v2857_v11  ;;  %v2682_v30 = vunpack.c.l.bf16 %v2906_v50  ;;  %v2746_v11 = vunpack.c.l.bf16 %v2922_v62  ;;  %v2626_v50 = vunpack.c.l.bf16 %v2892_v22 }
 0x267   :  { %1266 = vmatpush.msrb.mxu2 %v2503_v13  ;;  %1446 = vmatpush.msra.mxu0 %v2606_v24  ;;  %v2913_v13 = vld [vmem:[%s4149_s7 + $0x4a8] sm:$0xff]   ;;  %v2714_v24 = vunpack.c.l.bf16 %v2914_v17 }
 0x268   :  { %1407 = vmatpush.msra.mxu3 %v2539_v25  ;;  %1425 = vmatpush.msrb.mxu1 %v2575_v37  ;;  %v2639_v25 = vunpack.c.h.bf16 %v2895_v29  ;;  %v2663_v37 = vunpack.c.h.bf16 %v2901_v32  ;;  %v2909_v17 = vld [vmem:[%s4149_s7 + $0x488] sm:$0xff]  }
 0x269   :  { %1267 = vmatpush.msrb.mxu2 %v2502_v39  ;;  %1447 = vmatpush.msra.mxu0 %v2603_v16  ;;  %v2711_v39 = vunpack.c.h.bf16 %v2913_v13  ;;  %v2894_v16 = vld [vmem:[%s4149_s7 + $0x408] sm:$0xff]  }
 0x26a   :  { %1408 = vmatpush.msra.mxu3 %v2538_v44  ;;  %1426 = vmatpush.msrb.mxu1 %v2574_v0  ;;  %v2662_v44 = vunpack.c.l.bf16 %v2901_v32  ;;  %v2904_v0 = vld [vmem:[%s4149_s7 + $0x458] sm:$0xff]   ;;  %v2634_v54 = vunpack.c.l.bf16 %v2894_v16  ;;  %v2890_v29 = vld [vmem:[%s4149_s7 + $0x3e8] sm:$0xff]  }
 0x26b   :  { %1268 = vmatpush.msrb.mxu2 %v2499_v9  ;;  %1448 = vmatpush.msra.mxu0 %v2602_v36  ;;  %v2678_v9 = vunpack.c.l.bf16 %v2905_v45  ;;  %v2710_v36 = vunpack.c.l.bf16 %v2913_v13  ;;  %v2675_v12 = vunpack.c.h.bf16 %v2904_v0  ;;  %v2908_v45 = vld [vmem:[%s4149_s7 + $0x480] sm:$0xff]  }
 0x26c   :  { %1409 = vmatpush.msra.mxu3 %v2535_v47  ;;  %1427 = vmatpush.msrb.mxu1 %v2571_v48  ;;  %v2635_v47 = vunpack.c.h.bf16 %v2894_v16  ;;  %v2659_v48 = vunpack.c.h.bf16 %v2900_v15  ;;  %v2919_v16 = vld [vmem:[%s4149_s7 + $0x4d8] sm:$0xff]  }
 0x26d   :  { %1269 = vmatpush.msrb.mxu2 %v2498_v35  ;;  %1449 = vmatpush.msra.mxu0 %v2599_v51  ;;  %v2707_v35 = vunpack.c.h.bf16 %v2912_v19  ;;  %v2893_v51 = vld [vmem:[%s4149_s7 + $0x400] sm:$0xff]  }
 0x26e   :  { %1410 = vmatpush.msra.mxu3 %v2534_v46  ;;  %1428 = vmatpush.msrb.mxu1 %v2570_v57  ;;  %v2658_v46 = vunpack.c.l.bf16 %v2900_v15  ;;  %v2911_v57 = vld [vmem:[%s4149_s7 + $0x498] sm:$0xff]  }
 0x26f   :  { %1270 = vmatpush.msrb.mxu2 %v2495_v60  ;;  %1450 = vmatpush.msra.mxu0 %v2598_v20  ;;  %v2674_v60 = vunpack.c.l.bf16 %v2904_v0  ;;  %v2706_v20 = vunpack.c.l.bf16 %v2912_v19  ;;  %v2096_v0 = vld [vmem:[%s4149_s7 + $0x47c] sm:$0xf] }
 0x270   :  { %1411 = vmatpush.msra.mxu3 %v1343_v63  ;;  %1429 = vmatpush.msrb.mxu1 %v2567_v38  ;;  %v2631_v63 = vunpack.c.h.bf16 %v2893_v51  ;;  %v2655_v38 = vunpack.c.h.bf16 %v2899_v61 }
 0x271   :  { %1271 = vmatpush.msrb.mxu2 %v2494_v31  ;;  %1412 = vmatmul.f32.vlgmr.msra.gmra.mxu3 %v1386_v2  ;;  %v2703_v31 = vunpack.c.h.bf16 %v2911_v57  ;;  %v2910_v2 = vld [vmem:[%s4149_s7 + $0x490] sm:$0xff]  }
 0x272   :  { %1451 = vmatpush.msra.mxu0 %v2595_v49  ;;  %2094 = vmatpush.msk.msrb.mxu3 %vm714_vm5, %v1539_v55  ;;  %v2750_v49 = vunpack.c.l.bf16 %v4041_v52  ;;  %v2630_v55 = vunpack.c.l.bf16 %v2893_v51  ;;  %v2699_v58 = vunpack.c.h.bf16 %v2910_v2  ;;  %v2734_v51 = vunpack.c.l.bf16 %v2919_v16 }
 0x273   :  { %1430 = vmatpush.msrb.mxu1 %v2566_v3  ;;  %2052 = vmatmul.msk.f32.vlgmr.msra.gmra.mxu0 %vm711_vm6, %v1388_v7  ;;  %v1542_v3 = vrot.slane %v3926_v43, 4  ;;  %v2747_v7 = vunpack.c.h.bf16 %v2922_v62 }
 0x274   :  { %1570 = vmatpush.msrb.mxu0 %v2671_v59  ;;  %1272 = vmatpush.msrb.mxu2 %v2491_v5  ;;  %v2654_v59 = vunpack.c.l.bf16 %v2899_v61  ;;  %v2702_v5 = vunpack.c.l.bf16 %v2911_v57  ;;  %v2888_v61 = vld [vmem:[%s4149_s7 + $0x3d8] sm:$0xff]  }
 0x275   :  { %1598 = vmatpush.msrb.mxu3 %v2687_v23  ;;  %1431 = vmatpush.msrb.mxu1 %v2563_v53  ;;  %v2627_v23 = vunpack.c.h.bf16 %v2892_v22  ;;  %v2651_v53 = vunpack.c.h.bf16 %v2898_v14  ;;  %v2135_v22 = vld [vmem:[%s4149_s7 + $0x518] sm:$0xf] }
 0x276   :  { %1571 = vmatpush.msrb.mxu0 %v2670_v8  ;;  %1273 = vmatpush.msrb.mxu2 %v2490_v10  ;;  %v2921_v8 = vld [vmem:[%s4149_s7 + $0x4e8] sm:$0xff]   ;;  %v2891_v10 = vld [vmem:[%s4149_s7 + $0x3f0] sm:$0xff]  }
 0x277   :  { %1432 = vmatmul.f32.vlgmr.msrb.gmra.mxu1 %v1387_v26  ;;  %1599 = vmatpush.msrb.mxu3 %v2686_v41  ;;  %v2897_v41 = vld [vmem:[%s4149_s7 + $0x420] sm:$0xff]   ;;  %v2743_v26 = vunpack.c.h.bf16 %v2921_v8  ;;  %v2742_v32 = vunpack.c.l.bf16 %v2921_v8 }
 0x278   :  { %1704 = vmatpush.msra.mxu1 %v2718_v21  ;;  %1572 = vmatpush.msrb.mxu0 %v2667_v4  ;;  %v2650_v21 = vunpack.c.l.bf16 %v2898_v14  ;;  %v2698_v4 = vunpack.c.l.bf16 %v2910_v2  ;;  %v2646_v13 = vunpack.c.l.bf16 %v2897_v41  ;;  %v1540_v14 = vrot.slane %v3864_v34, 4 }
 0x279   :  { %1274 = vmatpush.msrb.mxu2 %v2487_v1  ;;  %1600 = vmatpush.msrb.mxu3 %v2683_v33  ;;  %v2623_v1 = vunpack.c.h.bf16 %v2891_v10  ;;  %v2647_v33 = vunpack.c.h.bf16 %v2897_v41 }
 0x27a   :  { %1705 = vmatpush.msra.mxu1 %v2715_v27  ;;  %1573 = vmatpush.msrb.mxu0 %v2666_v28  ;;  %v2695_v27 = vunpack.c.h.bf16 %v2909_v17  ;;  %v2920_v28 = vld [vmem:[%s4149_s7 + $0x4e0] sm:$0xff]  }
 0x27b   :  { %1275 = vmatpush.msrb.mxu2 %v2486_v18  ;;  %1601 = vmatpush.msrb.mxu3 %v2682_v30  ;;  %v2622_v18 = vunpack.c.l.bf16 %v2891_v10  ;;  %v2896_v30 = vld [vmem:[%s4149_s7 + $0x418] sm:$0xff]   ;;  %v2738_v15 = vunpack.c.l.bf16 %v2920_v28  ;;  %v2924_v10 = vld [vmem:[%s4149_s7 + $0x500] sm:$0xff]  }
 0x27c   :  { %1706 = vmatpush.msra.mxu1 %v2714_v24  ;;  %1276 = vmatmul.f32.vlgmr.msrb.gmra.mxu2 %v3838_v6  ;;  %v2694_v24 = vunpack.c.l.bf16 %v2909_v17  ;;  %v2642_v19 = vunpack.c.l.bf16 %v2896_v30  ;;  %v2755_v41 = vunpack.c.h.bf16 %v2924_v10  ;;  %v2754_v17 = vunpack.c.l.bf16 %v2924_v10 }
 0x27d   :  { %1550 = vmatpush.msra.mxu2 %v2639_v25  ;;  %1574 = vmatpush.msrb.mxu0 %v2663_v37  ;;  %v2739_v25 = vunpack.c.h.bf16 %v2920_v28  ;;  %v2619_v37 = vunpack.c.h.bf16 %v2890_v29 }
 0x27e   :  { %1602 = vmatpush.msrb.mxu3 %v2679_v56  ;;  %1707 = vmatpush.msra.mxu1 %v2711_v39  ;;  %v2643_v56 = vunpack.c.h.bf16 %v2896_v30  ;;  %v2691_v39 = vunpack.c.h.bf16 %v2908_v45 }
 0x27f   :  { %1551 = vmatpush.msra.mxu2 %v2638_v42  ;;  %1575 = vmatpush.msrb.mxu0 %v2662_v44  ;;  %v2618_v42 = vunpack.c.l.bf16 %v2890_v29  ;;  %v2889_v44 = vld [vmem:[%s4149_s7 + $0x3e0] sm:$0xff]  }
 0x280   :  { %1603 = vmatpush.msrb.mxu3 %v2678_v9  ;;  %1708 = vmatpush.msra.mxu1 %v2710_v36  ;;  %v2690_v9 = vunpack.c.l.bf16 %v2908_v45  ;;  %v2735_v36 = vunpack.c.h.bf16 %v2919_v16 }
 0x281   :  { %1552 = vmatpush.msra.mxu2 %v2635_v47  ;;  %1576 = vmatpush.msrb.mxu0 %v2659_v48  ;;  %v2615_v47 = vunpack.c.h.bf16 %v2889_v44  ;;  %v1653_v48 = vunpack.c.l.bf16 %v2096_v0 }
 0x282   :  { %1604 = vmatpush.msrb.mxu3 %v2675_v12  ;;  %1709 = vmatpush.msra.mxu1 %v2707_v35  ;;  %v2918_v12 = vld [vmem:[%s4149_s7 + $0x4d0] sm:$0xff]   ;;  %v1541_v35 = vrot.slane %v3838_v6, 4 }
 0x283   :  { %1553 = vmatpush.msra.mxu2 %v2634_v54  ;;  %1577 = vmatpush.msrb.mxu0 %v2658_v46  ;;  %v2614_v54 = vunpack.c.l.bf16 %v2889_v44  ;;  %v1694_v46 = vrot.slane %v3864_v34, 6  ;;  %v2731_v57 = vunpack.c.h.bf16 %v2918_v12 }
 0x284   :  { %1605 = vmatpush.msrb.mxu3 %v2674_v60  ;;  %1710 = vmatpush.msra.mxu1 %v2706_v20  ;;  %v2611_v60 = vunpack.c.h.bf16 %v2888_v61  ;;  %v2917_v20 = vld [vmem:[%s4149_s7 + $0x4c8] sm:$0xff]  }
 0x285   :  { %1554 = vmatpush.msra.mxu2 %v2631_v63  ;;  %1578 = vmatpush.msrb.mxu0 %v2655_v38  ;;  %v2730_v63 = vunpack.c.l.bf16 %v2918_v12  ;;  %v2136_v38 = vld [vmem:[%s4149_s7 + $0x51c] sm:$0x3]  ;;  %v2727_v62 = vunpack.c.h.bf16 %v2917_v20  ;;  %v2726_v2 = vunpack.c.l.bf16 %v2917_v20 }
 0x286   :  { %2095 = vmatmul.msk.f32.vlgmr.msrb.gmra.mxu3 %vm711_vm6, %v1542_v3  ;;  %1711 = vmatpush.msra.mxu1 %v2703_v31  ;;  %v2610_v31 = vunpack.c.l.bf16 %v2888_v61  ;;  %v2926_v3 = vld [vmem:[%s4149_s7 + $0x510] sm:$0xff]  }
 0x287   :  { %1724 = vmatpush.msra.mxu3 %v2750_v49  ;;  %1555 = vmatpush.msra.mxu2 %v2630_v55  ;;  %v1693_v49 = vunpack.c.l.bf16 %v2136_v38  ;;  %v2916_v55 = vld [vmem:[%s4149_s7 + $0x4c0] sm:$0xff]   ;;  %v2762_v34 = vunpack.c.l.bf16 %v2926_v3 }
 0x288   :  { %1579 = vmatpush.msrb.mxu0 %v2654_v59  ;;  %1712 = vmatpush.msra.mxu1 %v2702_v5  ;;  %v1692_v59 = vunpack.c.l.bf16 %v2135_v22  ;;  %v2723_v5 = vunpack.c.h.bf16 %v2916_v55 }
 0x289   :  { %1725 = vmatpush.msra.mxu3 %v2747_v7  ;;  %1556 = vmatpush.msra.mxu2 %v2627_v23  ;;  %v2763_v7 = vunpack.c.h.bf16 %v2926_v3  ;;  %v2722_v23 = vunpack.c.l.bf16 %v2916_v55 }
 0x28a   :  { %1580 = vmatpush.msrb.mxu0 %v2651_v53  ;;  %1713 = vmatpush.msra.mxu1 %v2699_v58  ;;  %v2925_v53 = vld [vmem:[%s4149_s7 + $0x508] sm:$0xff]   ;;  %v2719_v58 = vunpack.c.h.bf16 %v3986_v40  ;;  %v2751_v40 = vunpack.c.h.bf16 %v4041_v52 }
 0x28b   :  { %1726 = vmatpush.msra.mxu3 %v2746_v11  ;;  %1557 = vmatpush.msra.mxu2 %v2626_v50  ;;  %v2759_v8 = vunpack.c.h.bf16 %v2925_v53  ;;  %v1695_v11 = vrot.slane %v3838_v6, 6  ;;  %v2758_v50 = vunpack.c.l.bf16 %v2925_v53 }
 0x28c   :  { %1581 = vmatpush.msrb.mxu0 %v2650_v21  ;;  %1714 = vmatpush.msra.mxu1 %v2698_v4  ;;  %v1696_v21 = vrot.slane %v3926_v43, 6  ;;  %v2765_v43 = vld [vmem:[%s4151_s9] sm:$0xff]  }
 0x28d   :  { %1727 = vmatpush.msra.mxu3 %v2743_v26  ;;  %1558 = vmatpush.msra.mxu2 %v2623_v1  ;;  %v2767_v45 = vunpack.c.h.bf16 %v2765_v43 }
 0x28e   :  { %1582 = vmatpush.msrb.mxu0 %v2647_v33  ;;  %1715 = vmatpush.msra.mxu1 %v2695_v27  ;;  %v2927_v27 = vld [vmem:[%s4151_s9 + $0x8] sm:$0xff]  }
 0x28f   :  { %1728 = vmatpush.msra.mxu3 %v2742_v32  ;;  %1559 = vmatpush.msra.mxu2 %v2622_v18  ;;  %v2771_v28 = vunpack.c.h.bf16 %v2927_v27  ;;  %v2770_v30 = vunpack.c.l.bf16 %v2927_v27 }
 0x290   :  { %1583 = vmatpush.msrb.mxu0 %v2646_v13  ;;  %1716 = vmatpush.msra.mxu1 %v2694_v24  ;;  %v2766_v24 = vunpack.c.l.bf16 %v2765_v43 }
 0x291   :  { %1729 = vmatpush.msra.mxu3 %v2739_v25  ;;  %1560 = vmatpush.msra.mxu2 %v2619_v37 }
 0x292   :  { %1584 = vmatpush.msrb.mxu0 %v2643_v56  ;;  %1717 = vmatpush.msra.mxu1 %v2691_v39 }
 0x293   :  { %1730 = vmatpush.msra.mxu3 %v2738_v15  ;;  %1561 = vmatpush.msra.mxu2 %v2618_v42 }
 0x294   :  { %1585 = vmatpush.msrb.mxu0 %v2642_v19  ;;  %1718 = vmatpush.msra.mxu1 %v2690_v9 }
 0x295   :  { %1731 = vmatpush.msra.mxu3 %v2735_v36  ;;  %1586 = vmatmul.f32.vlgmr.msrb.gmra.mxu0 %v1541_v35 }
 0x296   :  { %1562 = vmatpush.msra.mxu2 %v2615_v47  ;;  %1719 = vmatpush.msra.mxu1 %v1653_v48 }
 0x297   :  { %1732 = vmatpush.msra.mxu3 %v2734_v51  ;;  %1720 = vmatmul.f32.vlgmr.msra.gmra.mxu1 %v1694_v46 }
 0x298   :  { %1563 = vmatpush.msra.mxu2 %v2614_v54  ;;  %1798 = vmatpush.msra.mxu0 %v2771_v28 }
 0x299   :  { %1733 = vmatpush.msra.mxu3 %v2731_v57 }
 0x29a   :  { %1564 = vmatpush.msra.mxu2 %v2611_v60  ;;  %1799 = vmatpush.msra.mxu0 %v2770_v30 }
 0x29b   :  { %1734 = vmatpush.msra.mxu3 %v2730_v63 }
 0x29c   :  { %1565 = vmatpush.msra.mxu2 %v2610_v31  ;;  %1800 = vmatpush.msra.mxu0 %v2767_v45 }
 0x29d   :  { %1735 = vmatpush.msra.mxu3 %v2727_v62  ;;  %1566 = vmatmul.f32.vlgmr.msra.gmra.mxu2 %v1540_v14 }
 0x29e   :  { %2137 = vmatpush.msk.msrb.mxu2 %vm714_vm5, %v1693_v49  ;;  %1801 = vmatpush.msra.mxu0 %v2766_v24 }
 0x29f   :  { %1736 = vmatpush.msra.mxu3 %v2726_v2 }
 0x2a0   :  { %1752 = vmatpush.msrb.mxu2 %v1692_v59 }
 0x2a1   :  { %1737 = vmatpush.msra.mxu3 %v2723_v5 }
 0x2a2   :  { %1753 = vmatpush.msrb.mxu2 %v2763_v7 }
 0x2a3   :  { %1738 = vmatpush.msra.mxu3 %v2722_v23  ;;  %v2954_v23 = vld [vmem:[%s4150_s8] ss:$0 sm:$0xff] }
 0x2a4   :  { %1754 = vmatpush.msrb.mxu2 %v2762_v34 }
 0x2a5   :  { %1739 = vmatpush.msra.mxu3 %v2719_v58  ;;  %v2955_v58 = vld [vmem:[%s4152_s10] ss:$0 sm:$0xff] }
 0x2a6   :  { %1740 = vmatmul.f32.vlgmr.msra.gmra.mxu3 %v1695_v11  ;;  %1755 = vmatpush.msrb.mxu2 %v2759_v8  ;;  %v775_v26 = vpop.f32.mrf.mxu0 }
 0x2a8   :  { %1756 = vmatpush.msrb.mxu2 %v2758_v50 }
 0x2aa   :  { %1757 = vmatpush.msrb.mxu2 %v2755_v41 }
 0x2ac   :  { %1758 = vmatpush.msrb.mxu2 %v2754_v17  ;;  %v800_v29 = vpop.f32.mrf.mxu1 }
 0x2ae   :  { %1759 = vmatpush.msrb.mxu2 %v2751_v40  ;;  %v755_v1 = vpop.f32.mrf.mxu3 }
 0x2af   :  { %2138 = vmatmul.msk.f32.vlgmr.msrb.gmra.mxu2 %vm711_vm6, %v1696_v21  ;;  %v820_v33 = vpop.f32.mrf.mxu0 }
 0x2b4   :  { %v735_v4 = vpop.f32.mrf.mxu2 }
 0x2b5   :  { %v756_v25 = vadd.f32 %v755_v1, %v735_v4 }
 0x2b6   :  { %v973_v37 = vpop.f32.mrf.mxu1 }
 0x2b7   :  { %v953_v32 = vpop.f32.mrf.mxu3  ;;  %v776_v16 = vadd.f32 %v775_v26, %v756_v25 }
 0x2b8   :  { %v974_v9 = vadd.f32 %v973_v37, %v953_v32 }
 0x2b9   :  { %v801_v42 = vadd.f32 %v800_v29, %v776_v16 }
 0x2bb   :  { %v821_v36 = vadd.f32 %v820_v33, %v801_v42 }
 0x2be   :  { %v840_v6 = vpop.f32.mrf.mxu2 }
 0x2bf   :  { %v841_v51 = vadd.f32 %v840_v6, %v821_v36 }
 0x2c9   :  { %v993_v52 = vpop.f32.mrf.mxu2  ;;  %v1107_v18 = vpop.f32.mrf.mxu0 }
 0x2ca   :  { %v994_v47 = vadd.f32 %v993_v52, %v974_v9 }
 0x2cc   :  { %v996_v57 = vadd.f32 %v994_v47, %v841_v51 }
 0x2d1   :  { %v1257_v44 = vpop.f32.mrf.mxu1 }
 0x2d2   :  { %v1127_v13 = vpop.f32.mrf.mxu3 }
 0x2d3   :  { %v1128_v48 = vadd.f32 %v1127_v13, %v1107_v18 }
 0x2dd   :  { %v1147_v56 = vpop.f32.mrf.mxu2  ;;  %v1297_v39 = vpop.f32.mrf.mxu0 }
 0x2de   :  { %v1148_v61 = vadd.f32 %v1147_v56, %v1128_v48 }
 0x2e0   :  { %v1150_v63 = vadd.f32 %v1148_v61, %v996_v57 }
 0x2f0   :  { %v1453_v19 = vpop.f32.mrf.mxu0 }
 0x2f4   :  { %v1413_v15 = vpop.f32.mrf.mxu3  ;;  %v1433_v54 = vpop.f32.mrf.mxu1 }
 0x2f5   :  { %v1434_v38 = vadd.f32 %v1433_v54, %v1413_v15 }
 0x2f7   :  { %v1454_v49 = vadd.f32 %v1453_v19, %v1434_v38 }
 0x2ff   :  { %v1277_v0 = vpop.f32.mrf.mxu2 }
 0x300   :  { %v1278_v12 = vadd.f32 %v1277_v0, %v1257_v44 }
 0x302   :  { %v1298_v60 = vadd.f32 %v1297_v39, %v1278_v12 }
 0x304   :  { %v1300_v62 = vadd.f32 %v1298_v60, %v1150_v63 }
 0x306   :  { %v1456_v3 = vadd.f32 %v1454_v49, %v1300_v62 }
 0x309   :  { %v1607_v35 = vpop.f32.mrf.mxu3 }
 0x312   :  { %v1587_v20 = vpop.f32.mrf.mxu0 }
 0x314   :  { %v1721_v14 = vpop.f32.mrf.mxu1 }
 0x320   :  { %v1567_v46 = vpop.f32.mrf.mxu2 }
 0x321   :  { %v1588_v31 = vadd.f32 %v1587_v20, %v1567_v46 }
 0x323   :  { %v1608_v55 = vadd.f32 %v1607_v35, %v1588_v31 }
 0x325   :  { %v1610_v5 = vadd.f32 %v1608_v55, %v1456_v3 }
 0x329   :  { %v1741_v22 = vpop.f32.mrf.mxu3 }
 0x32a   :  { %v1742_v2 = vadd.f32 %v1741_v22, %v1721_v14 }
 0x332   :  { %v1761_v59 = vpop.f32.mrf.mxu2 }
 0x333   :  { %v1762_v7 = vadd.f32 %v1761_v59, %v1742_v2 }
 0x335   :  { %v1764_v53 = vadd.f32 %v1762_v7, %v1610_v5 }
 0x337   :  { %v1769_v34 = vadd.f32 %v2954_v23, %v1764_v53 }
 0x339   :  { %2139 = vmatmul.msk.f32.vlgmr.msra.gmra.mxu0 %vm1782_vm14, %v1769_v34 }
 0x3b6   :  { %v1803_v8 = vpop.f32.mrf.mxu0 }
 0x3b7   :  { %v1804_v10 = vadd.f32 %v2955_v58, %v1803_v8 }
 0x3b9   :  { %1807 = vst.msk [vmem:[#allocation2] sm:$0x3] %vm1806_vm1, %v1804_v10 }
 0x3ba   :  { %1818 = dma.vmem_to_hbm [thread:$0]  %s1814_s0, 32, %s1816_s29, [#allocation3]  }
 0x3bb   :  { %2980 = dma.done.wait [#allocation3], 32  }
 0x3bc   :  { %2981 = vsyncadd [#allocation3], 4294967264 }
 0x3bd   :  { %1823 = vsyncpa [#allocation3], 1 }

</bundles_post_ra>
